<compile_context>
chip_gen: v7x
topology: tpu7x:2x2x1
jax: 0.10.0
libtpu: 0.0.40
codegen_flags: <defaults>
</compile_context>

<pallas_src>
import functools

import jax
import jax.numpy as jnp
from jax.experimental import pallas as pl
from jax.experimental.pallas import tpu as pltpu


def _round_up(x, m):
    return ((x + m - 1) // m) * m


def rnn_kernel(x_ref, w_ih_ref, w_hh_ref, b_ref, w_dec_ref, b_dec_ref,
               out_ref, h_ref, *, t_valid):
    """One (batch_block, time_chunk) grid step of the tanh RNN + final decoder.

    x_ref:     (Bb, Tt, Ip)   VMEM   current time chunk (batch-first)
    w_ih_ref:  (Ip, Hp)       VMEM   resident
    w_hh_ref:  (Hp, Hp)       VMEM   resident
    b_ref:     (1, Hp)        VMEM   b_ih + b_hh (pre-combined)
    w_dec_ref: (Hp, Op)       VMEM   resident
    b_dec_ref: (1, Op)        VMEM   resident
    out_ref:   (Bb, Op)       VMEM   written only on the last time chunk
    h_ref:     (Bb, Hp)       VMEM scratch, recurrent state (persists over grid)
    """
    t = pl.program_id(1)
    n_t = pl.num_programs(1)

    @pl.when(t == 0)
    def _():
        h_ref[...] = jnp.zeros_like(h_ref)          # h0 = zeros (matches torch.zeros)

    bb, tt_n, i_p = x_ref.shape
    h_p = w_hh_ref.shape[0]

    # ---- Hoisted input projection: one big MXU matmul for the whole chunk.
    # (Bb, Tt, Ip) -> (Bb*Tt, Ip); Tt is a multiple of 8 so this is a clean
    # tile-preserving collapse.
    x2 = x_ref[...].reshape(bb * tt_n, i_p)
    pre2 = jnp.dot(x2, w_ih_ref[...], preferred_element_type=jnp.float32) + b_ref[...]
    pre3 = pre2.reshape(bb, tt_n, h_p)

    # ---- Serial recurrence over the chunk, fully unrolled (static indices).
    w_hh = w_hh_ref[...]
    h = h_ref[...]
    needs_mask = (t_valid % tt_n) != 0              # only if T was padded in time
    for tt in range(tt_n):
        h_new = jnp.tanh(pre3[:, tt, :] +
                         jnp.dot(h, w_hh, preferred_element_type=jnp.float32))
        if needs_mask:
            valid = (t * tt_n + tt) < t_valid       # skip zero-padded tail steps
            h = jnp.where(valid, h_new, h)
        else:
            h = h_new
    h_ref[...] = h

    # ---- Decoder on the final hidden state.
    @pl.when(t == n_t - 1)
    def _():
        out_ref[...] = (jnp.dot(h, w_dec_ref[...],
                                preferred_element_type=jnp.float32)
                        + b_dec_ref[...])


def rnn_model_forward(x, params, *, max_t_block=32):
    """x: (B, T, I) float32 (batch_first, like the PyTorch module) -> (B, O)."""
    w_ih, w_hh, b_ih, b_hh, w_dec, b_dec = params
    B, T, I = x.shape
    H = w_hh.shape[0]
    O = w_dec.shape[0]

    # ---- Pad to hardware tiles (zeros are mathematically inert everywhere).
    i_p = _round_up(I, 128)
    h_p = _round_up(H, 128)
    o_p = _round_up(O, 128)
    b_p = _round_up(B, 8)
    bb = b_p if b_p <= 128 else 128                 # batch block (parallel axis)
    b_p = _round_up(b_p, bb)

    # Adaptive time chunk: short sequences -> single grid step (no pipeline
    # overhead); long sequences -> stream x chunk by chunk from HBM.
    t_block = min(max_t_block, _round_up(T, 8))
    t_p = _round_up(T, t_block)

    x_pad = jnp.pad(x, ((0, b_p - B), (0, t_p - T), (0, i_p - I)))
    w_ih_t = jnp.pad(w_ih.T, ((0, i_p - I), (0, h_p - H)))     # (Ip, Hp)
    w_hh_t = jnp.pad(w_hh.T, ((0, h_p - H), (0, h_p - H)))     # (Hp, Hp)
    w_dec_t = jnp.pad(w_dec.T, ((0, h_p - H), (0, o_p - O)))   # (Hp, Op)
    b_comb = jnp.pad((b_ih + b_hh).reshape(1, H), ((0, 0), (0, h_p - H)))
    b_dec2 = jnp.pad(b_dec.reshape(1, O), ((0, 0), (0, o_p - O)))

    n_b = b_p // bb
    n_t = t_p // t_block

    kernel = functools.partial(rnn_kernel, t_valid=T)

    out_pad = pl.pallas_call(
        kernel,
        out_shape=jax.ShapeDtypeStruct((b_p, o_p), jnp.float32),
        grid=(n_b, n_t),
        in_specs=[
            pl.BlockSpec((bb, t_block, i_p), lambda b_, t_: (b_, t_, 0)),  # x stream
            pl.BlockSpec((i_p, h_p), lambda b_, t_: (0, 0)),               # W_ih
            pl.BlockSpec((h_p, h_p), lambda b_, t_: (0, 0)),               # W_hh
            pl.BlockSpec((1, h_p), lambda b_, t_: (0, 0)),                 # b_ih+b_hh
            pl.BlockSpec((h_p, o_p), lambda b_, t_: (0, 0)),               # W_dec
            pl.BlockSpec((1, o_p), lambda b_, t_: (0, 0)),                 # b_dec
        ],
        out_specs=pl.BlockSpec((bb, o_p), lambda b_, t_: (b_, 0)),
        scratch_shapes=[pltpu.VMEM((bb, h_p), jnp.float32)],
        compiler_params=pltpu.CompilerParams(
            dimension_semantics=("parallel", "arbitrary")),
    )(x_pad, w_ih_t, w_hh_t, b_comb, w_dec_t, b_dec2)

    return out_pad[:B, :O]


def init_params(key, input_size, hidden_size, output_size):
    """Deterministic init mimicking nn.RNN / nn.Linear uniform(-1/sqrt(fan), 1/sqrt(fan))."""
    k = jax.random.split(key, 6)
    s_rnn = 1.0 / jnp.sqrt(hidden_size)
    s_dec = 1.0 / jnp.sqrt(hidden_size)
    w_ih = jax.random.uniform(k[0], (hidden_size, input_size), jnp.float32, -s_rnn, s_rnn)
    w_hh = jax.random.uniform(k[1], (hidden_size, hidden_size), jnp.float32, -s_rnn, s_rnn)
    b_ih = jax.random.uniform(k[2], (hidden_size,), jnp.float32, -s_rnn, s_rnn)
    b_hh = jax.random.uniform(k[3], (hidden_size,), jnp.float32, -s_rnn, s_rnn)
    w_dec = jax.random.uniform(k[4], (output_size, hidden_size), jnp.float32, -s_dec, s_dec)
    b_dec = jax.random.uniform(k[5], (output_size,), jnp.float32, -s_dec, s_dec)
    return (w_ih, w_hh, b_ih, b_hh, w_dec, b_dec)


def rnn_model_reference(x, params):
    """Pure-JAX reference (mirrors the PyTorch forward exactly)."""
    w_ih, w_hh, b_ih, b_hh, w_dec, b_dec = params
    B = x.shape[0]
    H = w_hh.shape[0]
    h0 = jnp.zeros((B, H), jnp.float32)

    def step(h, x_t):
        h_new = jnp.tanh(x_t @ w_ih.T + b_ih + h @ w_hh.T + b_hh)
        return h_new, None

    h_last, _ = jax.lax.scan(step, h0, jnp.transpose(x, (1, 0, 2)))
    return h_last @ w_dec.T + b_dec


if __name__ == "__main__":
    B, T, I, H, O = 2, 16, 16, 64, 4

    key = jax.random.PRNGKey(0)
    kx, kx2, kx3, kp = jax.random.split(key, 4)
    x = jax.random.normal(kx, (B, T, I), jnp.float32)
    params = init_params(kp, I, H, O)

    out = jax.block_until_ready(rnn_model_forward(x, params))
    ref = jax.block_until_ready(rnn_model_reference(x, params))
    assert out.shape == (B, O)
    assert jnp.allclose(out, ref, atol=1e-4, rtol=1e-4)

    # Non-multiple-of-8 sequence length + odd batch exercises the padded-tail
    # masking path and batch/sublane padding (single-chunk case).
    x2 = jax.random.normal(kx2, (3, 11, I), jnp.float32)
    out2 = jax.block_until_ready(rnn_model_forward(x2, params))
    ref2 = rnn_model_reference(x2, params)
    assert out2.shape == (3, O)
    assert jnp.allclose(out2, ref2, atol=1e-4, rtol=1e-4)

    # Long sequence exercises the multi-chunk streaming path (n_t > 1) with a
    # ragged final chunk.
    x3 = jax.random.normal(kx3, (5, 75, I), jnp.float32)
    out3 = jax.block_until_ready(rnn_model_forward(x3, params))
    ref3 = rnn_model_reference(x3, params)
    assert out3.shape == (5, O)
    assert jnp.allclose(out3, ref3, atol=1e-4, rtol=1e-4)

    print("KERNEL_OK")
</pallas_src>

<mosaic_0001>
module attributes {stable_mosaic.version = 11 : i64} {
  func.func @rnn_kernel(%arg0: i32, %arg1: i32, %arg2: memref<8x16x128xf32, #tpu.memory_space<vmem>>, %arg3: memref<128x128xf32, #tpu.memory_space<vmem>>, %arg4: memref<128x128xf32, #tpu.memory_space<vmem>>, %arg5: memref<1x128xf32, #tpu.memory_space<vmem>>, %arg6: memref<128x128xf32, #tpu.memory_space<vmem>>, %arg7: memref<1x128xf32, #tpu.memory_space<vmem>>, %arg8: memref<8x128xf32, #tpu.memory_space<vmem>>, %arg9: memref<8x128xf32, #tpu.memory_space<vmem>>) attributes {dimension_semantics = [#tpu.dimension_semantics<parallel>, #tpu.dimension_semantics<arbitrary>], iteration_bounds = array<i64: 1, 1>, scalar_prefetch = 0 : i64, scratch_operands = 1 : i64, tpu.core_type = #tpu.core_type<tc>, window_params = [{transform_indices = @transform_0, window_bounds = array<i64: 8, 16, 128>}, {pipeline_mode = #tpu.pipeline_mode<synchronous>, transform_indices = @transform_1, window_bounds = array<i64: 128, 128>}, {pipeline_mode = #tpu.pipeline_mode<synchronous>, transform_indices = @transform_2, window_bounds = array<i64: 128, 128>}, {pipeline_mode = #tpu.pipeline_mode<synchronous>, transform_indices = @transform_3, window_bounds = array<i64: 1, 128>}, {pipeline_mode = #tpu.pipeline_mode<synchronous>, transform_indices = @transform_4, window_bounds = array<i64: 128, 128>}, {pipeline_mode = #tpu.pipeline_mode<synchronous>, transform_indices = @transform_5, window_bounds = array<i64: 1, 128>}, {transform_indices = @transform_6, window_bounds = array<i64: 8, 128>}]} {
    %c0_i32 = arith.constant 0 : i32
    %0 = arith.cmpi eq, %arg1, %c0_i32 : i32
    %1 = arith.extui %0 : i1 to i32
    %c0_i32_0 = arith.constant 0 : i32
    %2 = arith.cmpi ne, %1, %c0_i32_0 : i32
    scf.if %2 {
      %cst_31 = arith.constant 0.000000e+00 : f32
      %97 = vector.broadcast %cst_31 : f32 to vector<8x128xf32>
      %c0_32 = arith.constant 0 : index
      %c0_33 = arith.constant 0 : index
      %98 = vector.load %arg9[%c0_32, %c0_33] : memref<8x128xf32, #tpu.memory_space<vmem>>, vector<8x128xf32>
      tpu.vector_store %arg9[%c0_32, %c0_33], %97 {strides = array<i32>} : memref<8x128xf32, #tpu.memory_space<vmem>>, vector<8x128xf32>,
    } else {
    }
    %c0 = arith.constant 0 : index
    %c0_1 = arith.constant 0 : index
    %c0_2 = arith.constant 0 : index
    %3 = vector.load %arg2[%c0, %c0_1, %c0_2] : memref<8x16x128xf32, #tpu.memory_space<vmem>>, vector<8x16x128xf32>
    %4 = vector.shape_cast %3 : vector<8x16x128xf32> to vector<128x128xf32>
    %c0_3 = arith.constant 0 : index
    %c0_4 = arith.constant 0 : index
    %5 = vector.load %arg3[%c0_3, %c0_4] : memref<128x128xf32, #tpu.memory_space<vmem>>, vector<128x128xf32>
    %cst = arith.constant dense<0.000000e+00> : vector<128x128xf32>
    %6 = tpu.matmul %4, %5, %cst {dimension_numbers = #tpu.dot_dimension_numbers<[1], [0], [0], [1], [0, 0, 1, 1], [], []>} : vector<128x128xf32>, vector<128x128xf32>, vector<128x128xf32> -> vector<128x128xf32>
    %c0_5 = arith.constant 0 : index
    %c0_6 = arith.constant 0 : index
    %7 = vector.load %arg5[%c0_5, %c0_6] : memref<1x128xf32, #tpu.memory_space<vmem>>, vector<1x128xf32>
    %8 = vector.broadcast %7 : vector<1x128xf32> to vector<128x128xf32>
    %9 = arith.addf %6, %8 : vector<128x128xf32>
    %10 = vector.shape_cast %9 : vector<128x128xf32> to vector<8x16x128xf32>
    %c0_7 = arith.constant 0 : index
    %c0_8 = arith.constant 0 : index
    %11 = vector.load %arg4[%c0_7, %c0_8] : memref<128x128xf32, #tpu.memory_space<vmem>>, vector<128x128xf32>
    %c0_9 = arith.constant 0 : index
    %c0_10 = arith.constant 0 : index
    %12 = vector.load %arg9[%c0_9, %c0_10] : memref<8x128xf32, #tpu.memory_space<vmem>>, vector<8x128xf32>
    %13 = vector.extract_strided_slice %10 {offsets = [0, 0, 0], sizes = [8, 1, 128], strides = [1, 1, 1]} : vector<8x16x128xf32> to vector<8x1x128xf32>
    %14 = vector.shape_cast %13 : vector<8x1x128xf32> to vector<8x128xf32>
    %cst_11 = arith.constant dense<0.000000e+00> : vector<8x128xf32>
    %15 = tpu.matmul %12, %11, %cst_11 {dimension_numbers = #tpu.dot_dimension_numbers<[1], [0], [0], [1], [0, 0, 1, 1], [], []>} : vector<8x128xf32>, vector<128x128xf32>, vector<8x128xf32> -> vector<8x128xf32>
    %16 = arith.addf %14, %15 : vector<8x128xf32>
    %17 = math.tanh %16 : vector<8x128xf32>
    %18 = vector.extract_strided_slice %10 {offsets = [0, 1, 0], sizes = [8, 1, 128], strides = [1, 1, 1]} : vector<8x16x128xf32> to vector<8x1x128xf32>
    %19 = vector.shape_cast %18 : vector<8x1x128xf32> to vector<8x128xf32>
    %cst_12 = arith.constant dense<0.000000e+00> : vector<8x128xf32>
    %20 = tpu.matmul %17, %11, %cst_12 {dimension_numbers = #tpu.dot_dimension_numbers<[1], [0], [0], [1], [0, 0, 1, 1], [], []>} : vector<8x128xf32>, vector<128x128xf32>, vector<8x128xf32> -> vector<8x128xf32>
    %21 = arith.addf %19, %20 : vector<8x128xf32>
    %22 = math.tanh %21 : vector<8x128xf32>
    %23 = vector.extract_strided_slice %10 {offsets = [0, 2, 0], sizes = [8, 1, 128], strides = [1, 1, 1]} : vector<8x16x128xf32> to vector<8x1x128xf32>
    %24 = vector.shape_cast %23 : vector<8x1x128xf32> to vector<8x128xf32>
    %cst_13 = arith.constant dense<0.000000e+00> : vector<8x128xf32>
    %25 = tpu.matmul %22, %11, %cst_13 {dimension_numbers = #tpu.dot_dimension_numbers<[1], [0], [0], [1], [0, 0, 1, 1], [], []>} : vector<8x128xf32>, vector<128x128xf32>, vector<8x128xf32> -> vector<8x128xf32>
    %26 = arith.addf %24, %25 : vector<8x128xf32>
    %27 = math.tanh %26 : vector<8x128xf32>
    %28 = vector.extract_strided_slice %10 {offsets = [0, 3, 0], sizes = [8, 1, 128], strides = [1, 1, 1]} : vector<8x16x128xf32> to vector<8x1x128xf32>
    %29 = vector.shape_cast %28 : vector<8x1x128xf32> to vector<8x128xf32>
    %cst_14 = arith.constant dense<0.000000e+00> : vector<8x128xf32>
    %30 = tpu.matmul %27, %11, %cst_14 {dimension_numbers = #tpu.dot_dimension_numbers<[1], [0], [0], [1], [0, 0, 1, 1], [], []>} : vector<8x128xf32>, vector<128x128xf32>, vector<8x128xf32> -> vector<8x128xf32>
    %31 = arith.addf %29, %30 : vector<8x128xf32>
    %32 = math.tanh %31 : vector<8x128xf32>
    %33 = vector.extract_strided_slice %10 {offsets = [0, 4, 0], sizes = [8, 1, 128], strides = [1, 1, 1]} : vector<8x16x128xf32> to vector<8x1x128xf32>
    %34 = vector.shape_cast %33 : vector<8x1x128xf32> to vector<8x128xf32>
    %cst_15 = arith.constant dense<0.000000e+00> : vector<8x128xf32>
    %35 = tpu.matmul %32, %11, %cst_15 {dimension_numbers = #tpu.dot_dimension_numbers<[1], [0], [0], [1], [0, 0, 1, 1], [], []>} : vector<8x128xf32>, vector<128x128xf32>, vector<8x128xf32> -> vector<8x128xf32>
    %36 = arith.addf %34, %35 : vector<8x128xf32>
    %37 = math.tanh %36 : vector<8x128xf32>
    %38 = vector.extract_strided_slice %10 {offsets = [0, 5, 0], sizes = [8, 1, 128], strides = [1, 1, 1]} : vector<8x16x128xf32> to vector<8x1x128xf32>
    %39 = vector.shape_cast %38 : vector<8x1x128xf32> to vector<8x128xf32>
    %cst_16 = arith.constant dense<0.000000e+00> : vector<8x128xf32>
    %40 = tpu.matmul %37, %11, %cst_16 {dimension_numbers = #tpu.dot_dimension_numbers<[1], [0], [0], [1], [0, 0, 1, 1], [], []>} : vector<8x128xf32>, vector<128x128xf32>, vector<8x128xf32> -> vector<8x128xf32>
    %41 = arith.addf %39, %40 : vector<8x128xf32>
    %42 = math.tanh %41 : vector<8x128xf32>
    %43 = vector.extract_strided_slice %10 {offsets = [0, 6, 0], sizes = [8, 1, 128], strides = [1, 1, 1]} : vector<8x16x128xf32> to vector<8x1x128xf32>
    %44 = vector.shape_cast %43 : vector<8x1x128xf32> to vector<8x128xf32>
    %cst_17 = arith.constant dense<0.000000e+00> : vector<8x128xf32>
    %45 = tpu.matmul %42, %11, %cst_17 {dimension_numbers = #tpu.dot_dimension_numbers<[1], [0], [0], [1], [0, 0, 1, 1], [], []>} : vector<8x128xf32>, vector<128x128xf32>, vector<8x128xf32> -> vector<8x128xf32>
    %46 = arith.addf %44, %45 : vector<8x128xf32>
    %47 = math.tanh %46 : vector<8x128xf32>
    %48 = vector.extract_strided_slice %10 {offsets = [0, 7, 0], sizes = [8, 1, 128], strides = [1, 1, 1]} : vector<8x16x128xf32> to vector<8x1x128xf32>
    %49 = vector.shape_cast %48 : vector<8x1x128xf32> to vector<8x128xf32>
    %cst_18 = arith.constant dense<0.000000e+00> : vector<8x128xf32>
    %50 = tpu.matmul %47, %11, %cst_18 {dimension_numbers = #tpu.dot_dimension_numbers<[1], [0], [0], [1], [0, 0, 1, 1], [], []>} : vector<8x128xf32>, vector<128x128xf32>, vector<8x128xf32> -> vector<8x128xf32>
    %51 = arith.addf %49, %50 : vector<8x128xf32>
    %52 = math.tanh %51 : vector<8x128xf32>
    %53 = vector.extract_strided_slice %10 {offsets = [0, 8, 0], sizes = [8, 1, 128], strides = [1, 1, 1]} : vector<8x16x128xf32> to vector<8x1x128xf32>
    %54 = vector.shape_cast %53 : vector<8x1x128xf32> to vector<8x128xf32>
    %cst_19 = arith.constant dense<0.000000e+00> : vector<8x128xf32>
    %55 = tpu.matmul %52, %11, %cst_19 {dimension_numbers = #tpu.dot_dimension_numbers<[1], [0], [0], [1], [0, 0, 1, 1], [], []>} : vector<8x128xf32>, vector<128x128xf32>, vector<8x128xf32> -> vector<8x128xf32>
    %56 = arith.addf %54, %55 : vector<8x128xf32>
    %57 = math.tanh %56 : vector<8x128xf32>
    %58 = vector.extract_strided_slice %10 {offsets = [0, 9, 0], sizes = [8, 1, 128], strides = [1, 1, 1]} : vector<8x16x128xf32> to vector<8x1x128xf32>
    %59 = vector.shape_cast %58 : vector<8x1x128xf32> to vector<8x128xf32>
    %cst_20 = arith.constant dense<0.000000e+00> : vector<8x128xf32>
    %60 = tpu.matmul %57, %11, %cst_20 {dimension_numbers = #tpu.dot_dimension_numbers<[1], [0], [0], [1], [0, 0, 1, 1], [], []>} : vector<8x128xf32>, vector<128x128xf32>, vector<8x128xf32> -> vector<8x128xf32>
    %61 = arith.addf %59, %60 : vector<8x128xf32>
    %62 = math.tanh %61 : vector<8x128xf32>
    %63 = vector.extract_strided_slice %10 {offsets = [0, 10, 0], sizes = [8, 1, 128], strides = [1, 1, 1]} : vector<8x16x128xf32> to vector<8x1x128xf32>
    %64 = vector.shape_cast %63 : vector<8x1x128xf32> to vector<8x128xf32>
    %cst_21 = arith.constant dense<0.000000e+00> : vector<8x128xf32>
    %65 = tpu.matmul %62, %11, %cst_21 {dimension_numbers = #tpu.dot_dimension_numbers<[1], [0], [0], [1], [0, 0, 1, 1], [], []>} : vector<8x128xf32>, vector<128x128xf32>, vector<8x128xf32> -> vector<8x128xf32>
    %66 = arith.addf %64, %65 : vector<8x128xf32>
    %67 = math.tanh %66 : vector<8x128xf32>
    %68 = vector.extract_strided_slice %10 {offsets = [0, 11, 0], sizes = [8, 1, 128], strides = [1, 1, 1]} : vector<8x16x128xf32> to vector<8x1x128xf32>
    %69 = vector.shape_cast %68 : vector<8x1x128xf32> to vector<8x128xf32>
    %cst_22 = arith.constant dense<0.000000e+00> : vector<8x128xf32>
    %70 = tpu.matmul %67, %11, %cst_22 {dimension_numbers = #tpu.dot_dimension_numbers<[1], [0], [0], [1], [0, 0, 1, 1], [], []>} : vector<8x128xf32>, vector<128x128xf32>, vector<8x128xf32> -> vector<8x128xf32>
    %71 = arith.addf %69, %70 : vector<8x128xf32>
    %72 = math.tanh %71 : vector<8x128xf32>
    %73 = vector.extract_strided_slice %10 {offsets = [0, 12, 0], sizes = [8, 1, 128], strides = [1, 1, 1]} : vector<8x16x128xf32> to vector<8x1x128xf32>
    %74 = vector.shape_cast %73 : vector<8x1x128xf32> to vector<8x128xf32>
    %cst_23 = arith.constant dense<0.000000e+00> : vector<8x128xf32>
    %75 = tpu.matmul %72, %11, %cst_23 {dimension_numbers = #tpu.dot_dimension_numbers<[1], [0], [0], [1], [0, 0, 1, 1], [], []>} : vector<8x128xf32>, vector<128x128xf32>, vector<8x128xf32> -> vector<8x128xf32>
    %76 = arith.addf %74, %75 : vector<8x128xf32>
    %77 = math.tanh %76 : vector<8x128xf32>
    %78 = vector.extract_strided_slice %10 {offsets = [0, 13, 0], sizes = [8, 1, 128], strides = [1, 1, 1]} : vector<8x16x128xf32> to vector<8x1x128xf32>
    %79 = vector.shape_cast %78 : vector<8x1x128xf32> to vector<8x128xf32>
    %cst_24 = arith.constant dense<0.000000e+00> : vector<8x128xf32>
    %80 = tpu.matmul %77, %11, %cst_24 {dimension_numbers = #tpu.dot_dimension_numbers<[1], [0], [0], [1], [0, 0, 1, 1], [], []>} : vector<8x128xf32>, vector<128x128xf32>, vector<8x128xf32> -> vector<8x128xf32>
    %81 = arith.addf %79, %80 : vector<8x128xf32>
    %82 = math.tanh %81 : vector<8x128xf32>
    %83 = vector.extract_strided_slice %10 {offsets = [0, 14, 0], sizes = [8, 1, 128], strides = [1, 1, 1]} : vector<8x16x128xf32> to vector<8x1x128xf32>
    %84 = vector.shape_cast %83 : vector<8x1x128xf32> to vector<8x128xf32>
    %cst_25 = arith.constant dense<0.000000e+00> : vector<8x128xf32>
    %85 = tpu.matmul %82, %11, %cst_25 {dimension_numbers = #tpu.dot_dimension_numbers<[1], [0], [0], [1], [0, 0, 1, 1], [], []>} : vector<8x128xf32>, vector<128x128xf32>, vector<8x128xf32> -> vector<8x128xf32>
    %86 = arith.addf %84, %85 : vector<8x128xf32>
    %87 = math.tanh %86 : vector<8x128xf32>
    %88 = vector.extract_strided_slice %10 {offsets = [0, 15, 0], sizes = [8, 1, 128], strides = [1, 1, 1]} : vector<8x16x128xf32> to vector<8x1x128xf32>
    %89 = vector.shape_cast %88 : vector<8x1x128xf32> to vector<8x128xf32>
    %cst_26 = arith.constant dense<0.000000e+00> : vector<8x128xf32>
    %90 = tpu.matmul %87, %11, %cst_26 {dimension_numbers = #tpu.dot_dimension_numbers<[1], [0], [0], [1], [0, 0, 1, 1], [], []>} : vector<8x128xf32>, vector<128x128xf32>, vector<8x128xf32> -> vector<8x128xf32>
    %91 = arith.addf %89, %90 : vector<8x128xf32>
    %92 = math.tanh %91 : vector<8x128xf32>
    %c0_27 = arith.constant 0 : index
    %c0_28 = arith.constant 0 : index
    %93 = vector.load %arg9[%c0_27, %c0_28] : memref<8x128xf32, #tpu.memory_space<vmem>>, vector<8x128xf32>
    tpu.vector_store %arg9[%c0_27, %c0_28], %92 {strides = array<i32>} : memref<8x128xf32, #tpu.memory_space<vmem>>, vector<8x128xf32>,
    %c0_i32_29 = arith.constant 0 : i32
    %94 = arith.cmpi eq, %arg1, %c0_i32_29 : i32
    %95 = arith.extui %94 : i1 to i32
    %c0_i32_30 = arith.constant 0 : i32
    %96 = arith.cmpi ne, %95, %c0_i32_30 : i32
    scf.if %96 {
      %c0_31 = arith.constant 0 : index
      %c0_32 = arith.constant 0 : index
      %97 = vector.load %arg6[%c0_31, %c0_32] : memref<128x128xf32, #tpu.memory_space<vmem>>, vector<128x128xf32>
      %cst_33 = arith.constant dense<0.000000e+00> : vector<8x128xf32>
      %98 = tpu.matmul %92, %97, %cst_33 {dimension_numbers = #tpu.dot_dimension_numbers<[1], [0], [0], [1], [0, 0, 1, 1], [], []>} : vector<8x128xf32>, vector<128x128xf32>, vector<8x128xf32> -> vector<8x128xf32>
      %c0_34 = arith.constant 0 : index
      %c0_35 = arith.constant 0 : index
      %99 = vector.load %arg7[%c0_34, %c0_35] : memref<1x128xf32, #tpu.memory_space<vmem>>, vector<1x128xf32>
      %100 = vector.broadcast %99 : vector<1x128xf32> to vector<8x128xf32>
      %101 = arith.addf %98, %100 : vector<8x128xf32>
      %c0_36 = arith.constant 0 : index
      %c0_37 = arith.constant 0 : index
      %102 = vector.load %arg8[%c0_36, %c0_37] : memref<8x128xf32, #tpu.memory_space<vmem>>, vector<8x128xf32>
      tpu.vector_store %arg8[%c0_36, %c0_37], %101 {strides = array<i32>} : memref<8x128xf32, #tpu.memory_space<vmem>>, vector<8x128xf32>,
    } else {
    }
    return
  }
  func.func @transform_0(%arg0: i32, %arg1: i32) -> (i32, i32, i32) {
    %c0_i32 = arith.constant 0 : i32
    %c0_i32_0 = arith.constant 0 : i32
    return %arg0, %arg1, %c0_i32 : i32, i32, i32
  }
  func.func @transform_1(%arg0: i32, %arg1: i32) -> (i32, i32) {
    %c0_i32 = arith.constant 0 : i32
    %c0_i32_0 = arith.constant 0 : i32
    %c0_i32_1 = arith.constant 0 : i32
    return %c0_i32, %c0_i32_0 : i32, i32
  }
  func.func @transform_2(%arg0: i32, %arg1: i32) -> (i32, i32) {
    %c0_i32 = arith.constant 0 : i32
    %c0_i32_0 = arith.constant 0 : i32
    %c0_i32_1 = arith.constant 0 : i32
    return %c0_i32, %c0_i32_0 : i32, i32
  }
  func.func @transform_3(%arg0: i32, %arg1: i32) -> (i32, i32) {
    %c0_i32 = arith.constant 0 : i32
    %c0_i32_0 = arith.constant 0 : i32
    %c0_i32_1 = arith.constant 0 : i32
    return %c0_i32, %c0_i32_0 : i32, i32
  }
  func.func @transform_4(%arg0: i32, %arg1: i32) -> (i32, i32) {
    %c0_i32 = arith.constant 0 : i32
    %c0_i32_0 = arith.constant 0 : i32
    %c0_i32_1 = arith.constant 0 : i32
    return %c0_i32, %c0_i32_0 : i32, i32
  }
  func.func @transform_5(%arg0: i32, %arg1: i32) -> (i32, i32) {
    %c0_i32 = arith.constant 0 : i32
    %c0_i32_0 = arith.constant 0 : i32
    %c0_i32_1 = arith.constant 0 : i32
    return %c0_i32, %c0_i32_0 : i32, i32
  }
  func.func @transform_6(%arg0: i32, %arg1: i32) -> (i32, i32) {
    %c0_i32 = arith.constant 0 : i32
    %c0_i32_0 = arith.constant 0 : i32
    return %arg0, %c0_i32 : i32, i32
  }
}

</mosaic_0001>

<bundles_post_ra>
// kernel: tpu_custom_call.1
= control target key start
LH: loop header
LB: loop body
LE: loop exit
PB: predicated region body
PF: predicated region fallthrough
CT: control target
= control target key end

     0   :  { %11 = vsyncpa [#allocation4], 0  ;;  %s4955_s0 = inlined_call_operand.hbm [shape: f32[8,16,128], index: 0, kind: input, shape index: {}]   ;;  %s4956_s1 = inlined_call_operand.hbm [shape: f32[128,128], index: 1, kind: input, shape index: {}]   ;;  %s4957_s2 = inlined_call_operand.hbm [shape: f32[128,128], index: 2, kind: input, shape index: {}]   ;;  %s4958_s3 = inlined_call_operand.vmem [shape: f32[1,128], index: 3, kind: input, shape index: {}]   ;;  %s4959_s4 = inlined_call_operand.hbm [shape: f32[128,128], index: 4, kind: input, shape index: {}]   ;;  %s4960_s5 = inlined_call_operand.vmem [shape: f32[1,128], index: 5, kind: input, shape index: {}]   ;;  %s4961_s6 = inlined_call_operand.hbm [shape: f32[8,128], index: 6, kind: output, shape index: {}]  }
   0x1   :  { %12 = vsyncpa [#allocation7], 0 }
   0x2   :  { %13 = vsyncpa [#allocation10], 0 }
   0x3   :  { %14 = vsyncpa [#allocation5], 0  ;;  %s4223_s21 = smov [#allocation6]   ;;  %s4224_s23 = smov [#allocation3]  }
   0x4   :  { %s32_s22 = sshll.u32 %s4223_s21, 4  ;;  %s20_s24 = sshll.u32 %s4224_s23, 4  ;;  %s33_s22 = int_to_ptr.vmem [resolvable:$true] %s32_s22  ;;  %s4268_s24 = int_to_ptr.vmem [resolvable:$true] %s20_s24 }
   0x5   :  { %s4105_s27 = scalar_lea.hbm %s4956_s1, 2048 }
   0x6   :  { %p4106_p0 = scmp.ne.s32.totalorder %s4956_s1, %s4105_s27  ;;  %p4109_p1 = scmp.lt.u32.totalorder %s4105_s27, %s4956_s1 }
   0x8   :  { %p4111_p2 = pnand %p4109_p1, %p4106_p0 }
   0xa   :  { %4114 = shalt.err (!%p4111_p2)
}
   0xb   :  { %s4115_s8 = scalar_lea.vmem %s33_s22, 2048  ;;  %p4120_p4 = scmp.lt.s32.totalorder %s33_s22, %s33_s22 }
   0xc   :  { %p4116_p3 = scmp.ne.s32.totalorder %s33_s22, %s4115_s8  ;;  %p4121_p5 = scmp.lt.s32.totalorder %s4115_s8, %s4115_s8 }
   0xe   :  { %p4122_p6 = por %p4121_p5, %p4120_p4 }
  0x10   :  { %p4123_p7 = pnand %p4122_p6, %p4116_p3 }
  0x12   :  { %4126 = shalt.err (!%p4123_p7)
}
  0x13   :  { %s4225_s9 = smov 128   ;;  %s4226_s10 = smov 8  }
  0x14   :  { %38 = dma.hbm_to_vmem [thread:$0]  %s4956_s1, 2048, %s33_s22, [#allocation7], %s4225_s9, %s4225_s9, %s4226_s10  }
  0x15   :  { %s4127_s15 = scalar_lea.hbm %s4955_s0, 2048 }
  0x16   :  { %p4128_p8 = scmp.ne.s32.totalorder %s4955_s0, %s4127_s15  ;;  %p4131_p9 = scmp.lt.u32.totalorder %s4127_s15, %s4955_s0 }
  0x18   :  { %p4133_p10 = pnand %p4131_p9, %p4128_p8 }
  0x1a   :  { %4136 = shalt.err (!%p4133_p10)
}
  0x1b   :  { %s4137_s20 = scalar_lea.vmem %s4268_s24, 2048  ;;  %p4142_p12 = scmp.lt.s32.totalorder %s4268_s24, %s4268_s24 }
  0x1c   :  { %p4138_p11 = scmp.ne.s32.totalorder %s4268_s24, %s4137_s20  ;;  %p4143_p13 = scmp.lt.s32.totalorder %s4137_s20, %s4137_s20 }
  0x1e   :  { %p4144_p0 = por %p4143_p13, %p4142_p12 }
  0x20   :  { %p4145_p1 = pnand %p4144_p0, %p4138_p11 }
  0x22   :  { %4148 = shalt.err (!%p4145_p1)
}
  0x23   :  { %26 = dma.hbm_to_vmem [thread:$0]  %s4955_s0, 2048, %s4268_s24, [#allocation4], %s4225_s9, %s4225_s9, %s4226_s10  }
  0x24   :  { %s4227_s22 = smov [#allocation8]   ;;  %s4228_s25 = smov [#allocation9]  }
  0x25   :  { %s44_s23 = sshll.u32 %s4227_s22, 4  ;;  %s58_s26 = sshll.u32 %s4228_s25, 4  ;;  %s45_s23 = int_to_ptr.vmem [resolvable:$true] %s44_s23  ;;  %s4305_s26 = int_to_ptr.vmem [resolvable:$true] %s58_s26 }
  0x26   :  { %s4149_s29 = scalar_lea.hbm %s4957_s2, 2048 }
  0x27   :  { %p4150_p2 = scmp.ne.s32.totalorder %s4957_s2, %s4149_s29  ;;  %p4153_p3 = scmp.lt.u32.totalorder %s4149_s29, %s4957_s2 }
  0x29   :  { %p4155_p4 = pnand %p4153_p3, %p4150_p2 }
  0x2b   :  { %4158 = shalt.err (!%p4155_p4)
}
  0x2c   :  { %s4159_s0 = scalar_lea.vmem %s45_s23, 2048  ;;  %p4164_p6 = scmp.lt.s32.totalorder %s45_s23, %s45_s23 }
  0x2d   :  { %p4160_p5 = scmp.ne.s32.totalorder %s45_s23, %s4159_s0  ;;  %p4165_p7 = scmp.lt.s32.totalorder %s4159_s0, %s4159_s0 }
  0x2f   :  { %p4166_p8 = por %p4165_p7, %p4164_p6 }
  0x31   :  { %p4167_p9 = pnand %p4166_p8, %p4160_p5 }
  0x33   :  { %4170 = shalt.err (!%p4167_p9)
}
  0x34   :  { %50 = dma.hbm_to_vmem [thread:$0]  %s4957_s2, 2048, %s45_s23, [#allocation7], %s4225_s9, %s4225_s9, %s4226_s10  }
  0x35   :  { %s4171_s15 = scalar_lea.hbm %s4959_s4, 2048 }
  0x36   :  { %p4172_p10 = scmp.ne.s32.totalorder %s4959_s4, %s4171_s15  ;;  %p4175_p11 = scmp.lt.u32.totalorder %s4171_s15, %s4959_s4 }
  0x38   :  { %p4177_p12 = pnand %p4175_p11, %p4172_p10 }
  0x3a   :  { %4180 = shalt.err (!%p4177_p12)
}
  0x3b   :  { %s4181_s20 = scalar_lea.vmem %s4305_s26, 2048  ;;  %p4186_p0 = scmp.lt.s32.totalorder %s4305_s26, %s4305_s26 }
  0x3c   :  { %p4182_p13 = scmp.ne.s32.totalorder %s4305_s26, %s4181_s20  ;;  %p4187_p1 = scmp.lt.s32.totalorder %s4181_s20, %s4181_s20 }
  0x3e   :  { %p4188_p2 = por %p4187_p1, %p4186_p0 }
  0x40   :  { %p4189_p3 = pnand %p4188_p2, %p4182_p13 }
  0x42   :  { %4192 = shalt.err (!%p4189_p3)
}
  0x43   :  { %64 = dma.hbm_to_vmem [thread:$0]  %s4959_s4, 2048, %s4305_s26, [#allocation10], %s4225_s9, %s4225_s9, %s4226_s10  }
  0x44   :  { %4215 = dma.done.wait [#allocation4], 2048  }
  0x45   :  { %4216 = vsyncadd [#allocation4], 4294965248 }
  0x46   :  { %4217 = dma.done.wait [#allocation7], 4096  }
  0x47   :  { %4218 = vsyncadd [#allocation7], 4294963200 }
  0x48   :  { %4219 = dma.done.wait [#allocation10], 2048  }
  0x49   :  { %4220 = vsyncadd [#allocation10], 4294965248  ;;  %v4229_v0 = vmov 0.0|0.0   ;;  %vm4230_vm0 = vmmov 0   ;;  %v4231_v1 = vmov 0.0   ;;  %v100_v2 = vld [vmem:[#allocation6] sm:$0xff] }
  0x4a   :  { %3429 = vmatprep.subr.bf16.mxu1 %v4229_v0  ;;  %2834 = vmatprep.mubr.msk.f32.mxu1 %vm4230_vm0, %v4231_v1  ;;  %83 = vst [vmem:[#allocation2] sm:$0xff] %v4231_v1  ;;  %v101_v3 = vld [vmem:[#allocation6 + $0x8] sm:$0xff]  ;;  %v102_v4 = vld [vmem:[#allocation6 + $0x10] sm:$0xff]  ;;  %v103_v6 = vld [vmem:[#allocation6 + $0x18] sm:$0xff]  ;;  %vm396_vm1 = vcmask 1041409   ;;  %vm399_vm2 = vcmask 1042434  }
  0x4b   :  { %v3397_v5 = vpack.c.bf16 %v101_v3, %v100_v2  ;;  %v268_v7 = vld [vmem:[#allocation8] sm:$0xff]  ;;  %v269_v8 = vld [vmem:[#allocation8 + $0x8] sm:$0xff]  ;;  %v3401_v9 = vpack.c.bf16 %v103_v6, %v102_v4  ;;  %v270_v13 = vld [vmem:[#allocation8 + $0x10] sm:$0xff]  ;;  %vm402_vm3 = vcmask 1043459   ;;  %vm405_vm4 = vcmask 1044484   ;;  %s4232_s21 = smov [#allocation11]  }
  0x4c   :  { %v4346_v10 = vpack.c.bf16 %v269_v8, %v268_v7  ;;  %v104_v11 = vld [vmem:[#allocation6 + $0x20] sm:$0xff]  ;;  %v105_v12 = vld [vmem:[#allocation6 + $0x28] sm:$0xff]  ;;  %v271_v14 = vld [vmem:[#allocation8 + $0x18] sm:$0xff]  ;;  %vm408_vm5 = vcmask 1045509   ;;  %vm411_vm6 = vcmask 1046534   ;;  %vm414_vm7 = vcmask 1047559  }
  0x4d   :  { %3398 = vmatprep.subr.bf16.mxu0 %v3397_v5  ;;  %v4349_v15 = vpack.c.bf16 %v271_v14, %v270_v13  ;;  %v3405_v16 = vpack.c.bf16 %v105_v12, %v104_v11  ;;  %v272_v17 = vld [vmem:[#allocation8 + $0x20] sm:$0xff]  ;;  %v273_v18 = vld [vmem:[#allocation8 + $0x28] sm:$0xff]  ;;  %v106_v19 = vld [vmem:[#allocation6 + $0x30] sm:$0xff]  ;;  %s2412_s22 = sshll.u32 %s4232_s21, 4  ;;  %s2413_s22 = int_to_ptr.vmem [resolvable:$true] %s2412_s22 }
  0x4e   :  { %3400 = vmatpush3.bf16.msra.mxu0 %v3397_v5  ;;  %3431 = vmatpush3.bf16.msra.mxu1 %v4346_v10  ;;  %v107_v20 = vld [vmem:[#allocation6 + $0x38] sm:$0xff]  ;;  %v4353_v21 = vpack.c.bf16 %v273_v18, %v272_v17  ;;  %v274_v23 = vld [vmem:[#allocation8 + $0x30] sm:$0xff]  ;;  %v108_v25 = vld [vmem:[#allocation6 + $0x40] sm:$0xff]  ;;  %s4193_s23 = scalar_lea.vmem %s2413_s22, 128  ;;  %p4198_p5 = scmp.lt.s32.totalorder %s2413_s22, %s2413_s22 }
  0x4f   :  { %3402 = vmatprep.subr.bf16.mxu0 %v3401_v9  ;;  %3432 = vmatprep.subr.bf16.mxu1 %v4229_v0  ;;  %v3409_v22 = vpack.c.bf16 %v107_v20, %v106_v19  ;;  %v275_v24 = vld [vmem:[#allocation8 + $0x38] sm:$0xff]  ;;  %v109_v26 = vld [vmem:[#allocation6 + $0x48] sm:$0xff]  ;;  %v84_v27 = vld [vmem:[#allocation3] sm:$0xff]  ;;  %p4194_p4 = scmp.ne.s32.totalorder %s2413_s22, %s4193_s23  ;;  %p4199_p6 = scmp.lt.s32.totalorder %s4193_s23, %s4193_s23 }
  0x50   :  { %2778 = vmatprep.mubr.f32.mxu0 %v84_v27  ;;  %v4357_v28 = vpack.c.bf16 %v275_v24, %v274_v23  ;;  %v3413_v29 = vpack.c.bf16 %v109_v26, %v108_v25  ;;  %v276_v30 = vld [vmem:[#allocation8 + $0x40] sm:$0xff]  ;;  %v277_v31 = vld [vmem:[#allocation8 + $0x48] sm:$0xff]  ;;  %v110_v32 = vld [vmem:[#allocation6 + $0x50] sm:$0xff] }
  0x51   :  { %v111_v33 = vld [vmem:[#allocation6 + $0x58] sm:$0xff]  ;;  %v4361_v34 = vpack.c.bf16 %v277_v31, %v276_v30  ;;  %v278_v36 = vld [vmem:[#allocation8 + $0x50] sm:$0xff]  ;;  %v112_v38 = vld [vmem:[#allocation6 + $0x60] sm:$0xff]  ;;  %p4200_p7 = por %p4199_p6, %p4198_p5 }
  0x52   :  { %3404 = vmatpush3.bf16.msra.mxu0 %v3401_v9  ;;  %3434 = vmatpush3.bf16.msra.mxu1 %v4349_v15  ;;  %v3417_v35 = vpack.c.bf16 %v111_v33, %v110_v32  ;;  %v279_v37 = vld [vmem:[#allocation8 + $0x58] sm:$0xff]  ;;  %v113_v39 = vld [vmem:[#allocation6 + $0x68] sm:$0xff]  ;;  %v280_v42 = vld [vmem:[#allocation8 + $0x60] sm:$0xff] }
  0x53   :  { %3406 = vmatprep.subr.bf16.mxu0 %v3405_v16  ;;  %3435 = vmatprep.subr.bf16.mxu1 %v4229_v0  ;;  %v4365_v40 = vpack.c.bf16 %v279_v37, %v278_v36  ;;  %v3421_v41 = vpack.c.bf16 %v113_v39, %v112_v38  ;;  %v281_v43 = vld [vmem:[#allocation8 + $0x68] sm:$0xff]  ;;  %v114_v44 = vld [vmem:[#allocation6 + $0x70] sm:$0xff]  ;;  %v115_v45 = vld [vmem:[#allocation6 + $0x78] sm:$0xff]  ;;  %p4201_p8 = pnand %p4200_p7, %p4194_p4 }
  0x54   :  { %v4369_v46 = vpack.c.bf16 %v281_v43, %v280_v42  ;;  %v3425_v47 = vpack.c.bf16 %v115_v45, %v114_v44  ;;  %v282_v48 = vld [vmem:[#allocation8 + $0x70] sm:$0xff]  ;;  %v283_v49 = vld [vmem:[#allocation8 + $0x78] sm:$0xff]  ;;  %v85_v51 = vld [vmem:[#allocation3 + $0x8] sm:$0xff] }
  0x55   :  { %v4373_v50 = vpack.c.bf16 %v283_v49, %v282_v48  ;;  %v86_v52 = vld [vmem:[#allocation3 + $0x10] sm:$0xff]  ;;  %v87_v53 = vld [vmem:[#allocation3 + $0x18] sm:$0xff]  ;;  %v88_v54 = vld [vmem:[#allocation3 + $0x20] sm:$0xff] }
  0x56   :  { %3408 = vmatpush3.bf16.msra.mxu0 %v3405_v16  ;;  %3437 = vmatpush3.bf16.msra.mxu1 %v4353_v21  ;;  %v89_v55 = vld [vmem:[#allocation3 + $0x28] sm:$0xff]  ;;  %v90_v56 = vld [vmem:[#allocation3 + $0x30] sm:$0xff]  ;;  %v91_v57 = vld [vmem:[#allocation3 + $0x38] sm:$0xff] }
  0x57   :  { %3410 = vmatprep.subr.bf16.mxu0 %v3409_v22  ;;  %3438 = vmatprep.subr.bf16.mxu1 %v4229_v0  ;;  %v92_v58 = vld [vmem:[#allocation3 + $0x40] sm:$0xff]  ;;  %v93_v59 = vld [vmem:[#allocation3 + $0x48] sm:$0xff]  ;;  %v94_v60 = vld [vmem:[#allocation3 + $0x50] sm:$0xff] }
  0x58   :  { %v95_v61 = vld [vmem:[#allocation3 + $0x58] sm:$0xff]  ;;  %v96_v62 = vld [vmem:[#allocation3 + $0x60] sm:$0xff]  ;;  %v97_v63 = vld [vmem:[#allocation3 + $0x68] sm:$0xff] }
  0x59   :  { %v98_v2 = vld [vmem:[#allocation3 + $0x70] sm:$0xff]  ;;  %v99_v3 = vld [vmem:[#allocation3 + $0x78] sm:$0xff] }
  0x5a   :  { %3412 = vmatpush3.bf16.msra.mxu0 %v3409_v22  ;;  %3440 = vmatpush3.bf16.msra.mxu1 %v4357_v28  ;;  %v2423_v4 = vld [vmem:[%s4958_s3] ss:$0 sm:$0xff] }
  0x5b   :  { %3414 = vmatprep.subr.bf16.mxu0 %v3413_v29  ;;  %3441 = vmatprep.subr.bf16.mxu1 %v4229_v0 }
  0x5e   :  { %3416 = vmatpush3.bf16.msra.mxu0 %v3413_v29  ;;  %3443 = vmatpush3.bf16.msra.mxu1 %v4361_v34 }
  0x5f   :  { %3418 = vmatprep.subr.bf16.mxu0 %v3417_v35  ;;  %3444 = vmatprep.subr.bf16.mxu1 %v4229_v0 }
  0x62   :  { %3420 = vmatpush3.bf16.msra.mxu0 %v3417_v35  ;;  %3446 = vmatpush3.bf16.msra.mxu1 %v4365_v40 }
  0x63   :  { %3422 = vmatprep.subr.bf16.mxu0 %v3421_v41  ;;  %3447 = vmatprep.subr.bf16.mxu1 %v4229_v0 }
  0x66   :  { %3424 = vmatpush3.bf16.msra.mxu0 %v3421_v41  ;;  %3449 = vmatpush3.bf16.msra.mxu1 %v4369_v46 }
  0x67   :  { %3426 = vmatprep.subr.bf16.mxu0 %v3425_v47  ;;  %3450 = vmatprep.subr.bf16.mxu1 %v4229_v0 }
  0x6a   :  { %3428 = vmatpush3.bf16.msra.mxu0 %v3425_v47  ;;  %3452 = vmatpush3.bf16.msra.mxu1 %v4373_v50 }
  0x6b   :  { %3453 = vmatprep.subr.bf16.mxu0 %v4229_v0  ;;  %3477 = vmatprep.subr.bf16.mxu1 %v4229_v0 }
  0x6d   :  { %2779 = vmatmul.mubr.f32.vlgmr.msra.gmra.mrb[0].mxu0 %v85_v51  ;;  %2835 = vmatmul.mubr.f32.vlgmr.msra.gmra.mrb[0].mxu1 %v4231_v1 }
  0x6e   :  { %2781 = vmatprep.mubr.f32.mxu0 %v86_v52  ;;  %3455 = vmatpush3.bf16.msra.mxu0 %v4346_v10 }
  0x6f   :  { %3456 = vmatprep.subr.bf16.mxu0 %v4229_v0  ;;  %3479 = vmatpush3.bf16.msra.mxu1 %v4346_v10 }
  0x70   :  { %3480 = vmatprep.subr.bf16.mxu1 %v4229_v0  ;;  %2904 = vmatprep.mubr.msk.f32.mxu1 %vm4230_vm0, %v4231_v1 }
  0x71   :  { %2782 = vmatmul.mubr.f32.gmra.mrb[2].mxu0 %v87_v53 }
  0x72   :  { %2784 = vmatprep.mubr.f32.mxu0 %v88_v54  ;;  %3458 = vmatpush3.bf16.msra.mxu0 %v4349_v15 }
  0x73   :  { %3459 = vmatprep.subr.bf16.mxu0 %v4229_v0  ;;  %3482 = vmatpush3.bf16.msra.mxu1 %v4349_v15 }
  0x74   :  { %3483 = vmatprep.subr.bf16.mxu1 %v4229_v0 }
  0x75   :  { %2785 = vmatmul.mubr.f32.gmra.mrb[4].mxu0 %v89_v55 }
  0x76   :  { %2787 = vmatprep.mubr.f32.mxu0 %v90_v56  ;;  %3461 = vmatpush3.bf16.msra.mxu0 %v4353_v21 }
  0x77   :  { %3462 = vmatprep.subr.bf16.mxu0 %v4229_v0  ;;  %3485 = vmatpush3.bf16.msra.mxu1 %v4353_v21 }
  0x78   :  { %3486 = vmatprep.subr.bf16.mxu1 %v4229_v0 }
  0x79   :  { %2788 = vmatmul.mubr.f32.gmra.mrb[6].mxu0 %v91_v57 }
  0x7a   :  { %2790 = vmatprep.mubr.f32.mxu0 %v92_v58  ;;  %3464 = vmatpush3.bf16.msra.mxu0 %v4357_v28 }
  0x7b   :  { %3465 = vmatprep.subr.bf16.mxu0 %v4229_v0  ;;  %3488 = vmatpush3.bf16.msra.mxu1 %v4357_v28 }
  0x7c   :  { %3489 = vmatprep.subr.bf16.mxu1 %v4229_v0 }
  0x7d   :  { %2791 = vmatmul.mubr.f32.gmra.mrb[8].mxu0 %v93_v59 }
  0x7e   :  { %2793 = vmatprep.mubr.f32.mxu0 %v94_v60  ;;  %3467 = vmatpush3.bf16.msra.mxu0 %v4361_v34 }
  0x7f   :  { %3468 = vmatprep.subr.bf16.mxu0 %v4229_v0  ;;  %3491 = vmatpush3.bf16.msra.mxu1 %v4361_v34 }
  0x80   :  { %3492 = vmatprep.subr.bf16.mxu1 %v4229_v0 }
  0x81   :  { %2794 = vmatmul.mubr.f32.gmra.mrb[10].mxu0 %v95_v61 }
  0x82   :  { %2796 = vmatprep.mubr.f32.mxu0 %v96_v62  ;;  %3470 = vmatpush3.bf16.msra.mxu0 %v4365_v40 }
  0x83   :  { %3471 = vmatprep.subr.bf16.mxu0 %v4229_v0  ;;  %3494 = vmatpush3.bf16.msra.mxu1 %v4365_v40 }
  0x84   :  { %3495 = vmatprep.subr.bf16.mxu1 %v4229_v0 }
  0x85   :  { %2797 = vmatmul.mubr.f32.gmra.mrb[12].mxu0 %v97_v63 }
  0x86   :  { %2799 = vmatprep.mubr.f32.mxu0 %v98_v2  ;;  %3473 = vmatpush3.bf16.msra.mxu0 %v4369_v46 }
  0x87   :  { %3474 = vmatprep.subr.bf16.mxu0 %v4229_v0  ;;  %3497 = vmatpush3.bf16.msra.mxu1 %v4369_v46 }
  0x88   :  { %3498 = vmatprep.subr.bf16.mxu1 %v4229_v0 }
  0x89   :  { %2800 = vmatmul.mubr.f32.gmra.mrb[14].mxu0 %v99_v3 }
  0x8a   :  { %3476 = vmatpush3.bf16.msra.mxu0 %v4373_v50  ;;  %2869 = vmatprep.mubr.msk.f32.mxu0 %vm4230_vm0, %v4231_v1 }
  0x8b   :  { %3500 = vmatpush3.bf16.msra.mxu1 %v4373_v50  ;;  %3501 = vmatprep.subr.bf16.mxu0 %v4229_v0 }
  0x8c   :  { %3525 = vmatprep.subr.bf16.mxu1 %v4229_v0 }
 0x140   :  { %v2780_v5 = vpop.f32.mrb[0].mxu0  ;;  %v351_v6 = vpop.f32.mrb[0].mxu1 }
 0x141   :  { %v4419_v7 = vadd.f32 %v2780_v5, %v2423_v4  ;;  %v189_v8 = vpop.f32.mrb[1].mxu0  ;;  %v2836_v9 = vpop.f32.mrb[1].mxu1  ;;  %v356_v22 = vrot.slane %v351_v6, 1  ;;  %v357_v25 = vrot.slane %v351_v6, 2  ;;  %v358_v30 = vrot.slane %v351_v6, 3 }
 0x142   :  { %v359_v32 = vrot.slane %v351_v6, 4  ;;  %v360_v35 = vrot.slane %v351_v6, 5  ;;  %v4438_v38 = vadd.f32 %v2423_v4, %v189_v8  ;;  %v361_v54 = vrot.slane %v351_v6, 6 }
 0x143   :  { %v362_v60 = vrot.slane %v351_v6, 7 }
 0x144   :  { %v2783_v11 = vpop.f32.mrb[2].mxu0  ;;  %v371_v49 = vadd.f32 %v351_v6, %v4438_v38 }
 0x145   :  { %v4421_v12 = vadd.f32 %v2783_v11, %v2423_v4  ;;  %v199_v13 = vpop.f32.mrb[3].mxu0 }
 0x146   :  { %v4427_v23 = vadd.f32 %v2423_v4, %v199_v13 }
 0x148   :  { %v2786_v14 = vpop.f32.mrb[4].mxu0  ;;  %v372_v37 = vadd.f32 %v356_v22, %v4427_v23 }
 0x149   :  { %v4423_v16 = vadd.f32 %v2786_v14, %v2423_v4  ;;  %v209_v17 = vpop.f32.mrb[5].mxu0 }
 0x14a   :  { %v4429_v26 = vadd.f32 %v2423_v4, %v209_v17  ;;  %3847 = vtanh.f32 %v372_v37 }
 0x14c   :  { %v2789_v18 = vpop.f32.mrb[6].mxu0  ;;  %v373_v42 = vadd.f32 %v357_v25, %v4429_v26 }
 0x14d   :  { %v4425_v19 = vadd.f32 %v2789_v18, %v2423_v4  ;;  %v219_v20 = vpop.f32.mrb[7].mxu0 }
 0x14e   :  { %v4433_v31 = vadd.f32 %v2423_v4, %v219_v20  ;;  %3849 = vtanh.f32 %v373_v42 }
 0x150   :  { %v2792_v24 = vpop.f32.mrb[8].mxu0  ;;  %v374_v44 = vadd.f32 %v358_v30, %v4433_v31 }
 0x151   :  { %v4431_v27 = vadd.f32 %v2792_v24, %v2423_v4  ;;  %v229_v29 = vpop.f32.mrb[9].mxu0 }
 0x152   :  { %v4435_v33 = vadd.f32 %v2423_v4, %v229_v29  ;;  %3851 = vtanh.f32 %v374_v44 }
 0x154   :  { %v2795_v36 = vpop.f32.mrb[10].mxu0  ;;  %v375_v45 = vadd.f32 %v359_v32, %v4435_v33  ;;  %v3848_v62 = vpop.eup %3847 }
 0x155   :  { %v4440_v39 = vadd.f32 %v2795_v36, %v2423_v4  ;;  %v239_v41 = vpop.f32.mrb[11].mxu0  ;;  %v395_v5 = vrot.slane %v3848_v62, 7 }
 0x156   :  { %v4443_v43 = vadd.f32 %v2423_v4, %v239_v41  ;;  %3853 = vtanh.f32 %v375_v45 }
 0x158   :  { %v2798_v47 = vpop.f32.mrb[12].mxu0  ;;  %v376_v48 = vadd.f32 %v360_v35, %v4443_v43  ;;  %v3850_v63 = vpop.eup %3849 }
 0x159   :  { %v4449_v51 = vadd.f32 %v2798_v47, %v2423_v4  ;;  %v249_v52 = vpop.f32.mrb[13].mxu0  ;;  %v398_v9 = vrot.slane %v3850_v63, 6 }
 0x15a   :  { %v4451_v53 = vadd.f32 %v2423_v4, %v249_v52  ;;  %3855 = vtanh.f32 %v376_v48 }
 0x15b   :  { %3857 = vtanh.f32 %v371_v49 }
 0x15c   :  { %v2801_v55 = vpop.f32.mrb[14].mxu0  ;;  %v377_v56 = vadd.f32 %v361_v54, %v4451_v53  ;;  %v3852_v2 = vpop.eup %3851 }
 0x15d   :  { %v4454_v57 = vadd.f32 %v2801_v55, %v2423_v4  ;;  %v259_v58 = vpop.f32.mrb[15].mxu0  ;;  %v401_v13 = vrot.slane %v3852_v2, 5 }
 0x15e   :  { %v4456_v59 = vadd.f32 %v2423_v4, %v259_v58  ;;  %3859 = vtanh.f32 %v377_v56 }
 0x160   :  { %v378_v61 = vadd.f32 %v362_v60, %v4456_v59  ;;  %v3854_v3 = vpop.eup %3853 }
 0x161   :  { %v404_v4 = vrot.slane %v3854_v3, 4 }
 0x162   :  { %3861 = vtanh.f32 %v378_v61 }
 0x164   :  { %v3856_v8 = vpop.eup %3855 }
 0x165   :  { %v3858_v11 = vpop.eup %3857  ;;  %v407_v17 = vrot.slane %v3856_v8, 3 }
 0x166   :  { %v397_v6 = vsel %vm396_vm1, %v395_v5, %v3858_v11 }
 0x167   :  { %v400_v18 = vsel %vm399_vm2, %v398_v9, %v397_v6 }
 0x168   :  { %v3860_v14 = vpop.eup %3859  ;;  %v403_v22 = vsel %vm402_vm3, %v401_v13, %v400_v18 }
 0x169   :  { %v410_v20 = vrot.slane %v3860_v14, 2  ;;  %v406_v25 = vsel %vm405_vm4, %v404_v4, %v403_v22 }
 0x16a   :  { %v409_v29 = vsel %vm408_vm5, %v407_v17, %v406_v25 }
 0x16b   :  { %v412_v32 = vsel %vm411_vm6, %v410_v20, %v409_v29 }
 0x16c   :  { %v3862_v24 = vpop.eup %3861 }
 0x16d   :  { %v413_v30 = vrot.slane %v3862_v24, 1 }
 0x16f   :  { %v415_v35 = vsel %vm414_vm7, %v413_v30, %v412_v32 }
 0x170   :  { %2870 = vmatmul.mubr.f32.vlgmr.msra.gmra.mrb[16].mxu0 %v415_v35 }
 0x171   :  { %3503 = vmatpush3.bf16.msra.mxu0 %v4346_v10  ;;  %2939 = vmatprep.mubr.msk.f32.mxu0 %vm4230_vm0, %v4231_v1 }
 0x172   :  { %3504 = vmatprep.subr.bf16.mxu0 %v4229_v0 }
 0x175   :  { %3506 = vmatpush3.bf16.msra.mxu0 %v4349_v15 }
 0x176   :  { %3507 = vmatprep.subr.bf16.mxu0 %v4229_v0 }
 0x179   :  { %3509 = vmatpush3.bf16.msra.mxu0 %v4353_v21 }
 0x17a   :  { %3510 = vmatprep.subr.bf16.mxu0 %v4229_v0 }
 0x17d   :  { %3512 = vmatpush3.bf16.msra.mxu0 %v4357_v28 }
 0x17e   :  { %3513 = vmatprep.subr.bf16.mxu0 %v4229_v0 }
 0x181   :  { %3515 = vmatpush3.bf16.msra.mxu0 %v4361_v34 }
 0x182   :  { %3516 = vmatprep.subr.bf16.mxu0 %v4229_v0 }
 0x185   :  { %3518 = vmatpush3.bf16.msra.mxu0 %v4365_v40 }
 0x186   :  { %3519 = vmatprep.subr.bf16.mxu0 %v4229_v0 }
 0x189   :  { %3521 = vmatpush3.bf16.msra.mxu0 %v4369_v46 }
 0x18a   :  { %3522 = vmatprep.subr.bf16.mxu0 %v4229_v0 }
 0x18d   :  { %3524 = vmatpush3.bf16.msra.mxu0 %v4373_v50 }
 0x18e   :  { %3549 = vmatprep.subr.bf16.mxu0 %v4229_v0 }
 0x243   :  { %v483_v36 = vpop.f32.mrb[16].mxu0 }
 0x244   :  { %v488_v37 = vrot.slane %v483_v36, 7  ;;  %v489_v41 = vrot.slane %v483_v36, 1  ;;  %v490_v42 = vrot.slane %v483_v36, 2  ;;  %v491_v44 = vrot.slane %v483_v36, 3  ;;  %v2871_v45 = vpop.f32.mrb[17].mxu0 }
 0x245   :  { %v504_v47 = vadd.f32 %v483_v36, %v4427_v23  ;;  %v492_v48 = vrot.slane %v483_v36, 4  ;;  %v493_v49 = vrot.slane %v483_v36, 5  ;;  %v494_v55 = vrot.slane %v483_v36, 6 }
 0x246   :  { %v503_v52 = vadd.f32 %v488_v37, %v4438_v38  ;;  %v505_v54 = vadd.f32 %v489_v41, %v4429_v26  ;;  %v506_v56 = vadd.f32 %v490_v42, %v4433_v31  ;;  %v507_v58 = vadd.f32 %v491_v44, %v4435_v33 }
 0x247   :  { %3863 = vtanh.f32 %v504_v47  ;;  %v508_v60 = vadd.f32 %v492_v48, %v4443_v43  ;;  %v509_v61 = vadd.f32 %v493_v49, %v4451_v53  ;;  %v510_v62 = vadd.f32 %v494_v55, %v4456_v59 }
 0x248   :  { %3865 = vtanh.f32 %v503_v52 }
 0x249   :  { %3867 = vtanh.f32 %v505_v54 }
 0x24a   :  { %3869 = vtanh.f32 %v506_v56 }
 0x24b   :  { %3871 = vtanh.f32 %v507_v58 }
 0x24c   :  { %3873 = vtanh.f32 %v508_v60 }
 0x24d   :  { %3875 = vtanh.f32 %v509_v61 }
 0x24e   :  { %3877 = vtanh.f32 %v510_v62 }
 0x251   :  { %v3864_v63 = vpop.eup %3863 }
 0x252   :  { %v3866_v2 = vpop.eup %3865 }
 0x253   :  { %v3868_v3 = vpop.eup %3867  ;;  %v527_v5 = vrot.slane %v3866_v2, 1 }
 0x254   :  { %v3870_v8 = vpop.eup %3869  ;;  %v529_v9 = vrot.slane %v3868_v3, 7 }
 0x255   :  { %v3872_v11 = vpop.eup %3871  ;;  %v528_v13 = vsel %vm396_vm1, %v3864_v63, %v527_v5  ;;  %v531_v14 = vrot.slane %v3870_v8, 6 }
 0x256   :  { %v3874_v4 = vpop.eup %3873  ;;  %v530_v6 = vsel %vm399_vm2, %v529_v9, %v528_v13  ;;  %v533_v17 = vrot.slane %v3872_v11, 5 }
 0x257   :  { %v3876_v18 = vpop.eup %3875  ;;  %v532_v20 = vsel %vm402_vm3, %v531_v14, %v530_v6  ;;  %v535_v22 = vrot.slane %v3874_v4, 4 }
 0x258   :  { %v3878_v24 = vpop.eup %3877  ;;  %v534_v25 = vsel %vm405_vm4, %v533_v17, %v532_v20  ;;  %v537_v29 = vrot.slane %v3876_v18, 3 }
 0x259   :  { %v536_v30 = vsel %vm408_vm5, %v535_v22, %v534_v25  ;;  %v539_v32 = vrot.slane %v3878_v24, 2 }
 0x25a   :  { %v538_v35 = vsel %vm411_vm6, %v537_v29, %v536_v30 }
 0x25b   :  { %v540_v36 = vsel %vm414_vm7, %v539_v32, %v538_v35 }
 0x25c   :  { %2905 = vmatmul.mubr.f32.vlgmr.msra.gmra.mrb[2].mxu1 %v540_v36 }
 0x25d   :  { %3527 = vmatpush3.bf16.msra.mxu1 %v4346_v10  ;;  %2974 = vmatprep.mubr.msk.f32.mxu1 %vm4230_vm0, %v4231_v1 }
 0x25e   :  { %3528 = vmatprep.subr.bf16.mxu1 %v4229_v0 }
 0x261   :  { %3530 = vmatpush3.bf16.msra.mxu1 %v4349_v15 }
 0x262   :  { %3531 = vmatprep.subr.bf16.mxu1 %v4229_v0 }
 0x265   :  { %3533 = vmatpush3.bf16.msra.mxu1 %v4353_v21 }
 0x266   :  { %3534 = vmatprep.subr.bf16.mxu1 %v4229_v0 }
 0x269   :  { %3536 = vmatpush3.bf16.msra.mxu1 %v4357_v28 }
 0x26a   :  { %3537 = vmatprep.subr.bf16.mxu1 %v4229_v0 }
 0x26d   :  { %3539 = vmatpush3.bf16.msra.mxu1 %v4361_v34 }
 0x26e   :  { %3540 = vmatprep.subr.bf16.mxu1 %v4229_v0 }
 0x271   :  { %3542 = vmatpush3.bf16.msra.mxu1 %v4365_v40 }
 0x272   :  { %3543 = vmatprep.subr.bf16.mxu1 %v4229_v0 }
 0x275   :  { %3545 = vmatpush3.bf16.msra.mxu1 %v4369_v46 }
 0x276   :  { %3546 = vmatprep.subr.bf16.mxu1 %v4229_v0 }
 0x279   :  { %3548 = vmatpush3.bf16.msra.mxu1 %v4373_v50 }
 0x27a   :  { %3573 = vmatprep.subr.bf16.mxu1 %v4229_v0 }
 0x32f   :  { %v608_v37 = vpop.f32.mrb[2].mxu1 }
 0x330   :  { %v613_v41 = vrot.slane %v608_v37, 6  ;;  %v614_v42 = vrot.slane %v608_v37, 7  ;;  %v615_v44 = vrot.slane %v608_v37, 1  ;;  %v616_v45 = vrot.slane %v608_v37, 2  ;;  %v2906_v47 = vpop.f32.mrb[3].mxu1 }
 0x331   :  { %v630_v48 = vadd.f32 %v608_v37, %v4429_v26  ;;  %v617_v49 = vrot.slane %v608_v37, 3  ;;  %v618_v52 = vrot.slane %v608_v37, 4  ;;  %v619_v56 = vrot.slane %v608_v37, 5 }
 0x332   :  { %v628_v54 = vadd.f32 %v613_v41, %v4438_v38  ;;  %v629_v55 = vadd.f32 %v614_v42, %v4427_v23  ;;  %v631_v58 = vadd.f32 %v615_v44, %v4433_v31  ;;  %v632_v60 = vadd.f32 %v616_v45, %v4435_v33 }
 0x333   :  { %3879 = vtanh.f32 %v630_v48  ;;  %v633_v61 = vadd.f32 %v617_v49, %v4443_v43  ;;  %v634_v62 = vadd.f32 %v618_v52, %v4451_v53  ;;  %v635_v63 = vadd.f32 %v619_v56, %v4456_v59 }
 0x334   :  { %3881 = vtanh.f32 %v628_v54 }
 0x335   :  { %3883 = vtanh.f32 %v629_v55 }
 0x336   :  { %3885 = vtanh.f32 %v631_v58 }
 0x337   :  { %3887 = vtanh.f32 %v632_v60 }
 0x338   :  { %3889 = vtanh.f32 %v633_v61 }
 0x339   :  { %3891 = vtanh.f32 %v634_v62 }
 0x33a   :  { %3893 = vtanh.f32 %v635_v63 }
 0x33d   :  { %v3880_v2 = vpop.eup %3879 }
 0x33e   :  { %v3882_v3 = vpop.eup %3881 }
 0x33f   :  { %v3884_v5 = vpop.eup %3883  ;;  %v652_v8 = vrot.slane %v3882_v3, 2 }
 0x340   :  { %v3886_v9 = vpop.eup %3885  ;;  %v653_v11 = vrot.slane %v3884_v5, 1 }
 0x341   :  { %v3888_v13 = vpop.eup %3887  ;;  %v656_v6 = vrot.slane %v3886_v9, 7 }
 0x342   :  { %v3890_v14 = vpop.eup %3889  ;;  %v654_v4 = vsel %vm396_vm1, %v653_v11, %v652_v8  ;;  %v658_v20 = vrot.slane %v3888_v13, 6 }
 0x343   :  { %v3892_v17 = vpop.eup %3891  ;;  %v655_v18 = vsel %vm399_vm2, %v3880_v2, %v654_v4  ;;  %v660_v25 = vrot.slane %v3890_v14, 5 }
 0x344   :  { %v3894_v22 = vpop.eup %3893  ;;  %v657_v24 = vsel %vm402_vm3, %v656_v6, %v655_v18  ;;  %v662_v30 = vrot.slane %v3892_v17, 4 }
 0x345   :  { %v659_v29 = vsel %vm405_vm4, %v658_v20, %v657_v24  ;;  %v664_v35 = vrot.slane %v3894_v22, 3 }
 0x346   :  { %v661_v32 = vsel %vm408_vm5, %v660_v25, %v659_v29 }
 0x347   :  { %v663_v36 = vsel %vm411_vm6, %v662_v30, %v661_v32 }
 0x348   :  { %v665_v37 = vsel %vm414_vm7, %v664_v35, %v663_v36 }
 0x349   :  { %2940 = vmatmul.mubr.f32.vlgmr.msra.gmra.mrb[18].mxu0 %v665_v37 }
 0x34a   :  { %3551 = vmatpush3.bf16.msra.mxu0 %v4346_v10  ;;  %3009 = vmatprep.mubr.msk.f32.mxu0 %vm4230_vm0, %v4231_v1 }
 0x34b   :  { %3552 = vmatprep.subr.bf16.mxu0 %v4229_v0 }
 0x34e   :  { %3554 = vmatpush3.bf16.msra.mxu0 %v4349_v15 }
 0x34f   :  { %3555 = vmatprep.subr.bf16.mxu0 %v4229_v0 }
 0x352   :  { %3557 = vmatpush3.bf16.msra.mxu0 %v4353_v21 }
 0x353   :  { %3558 = vmatprep.subr.bf16.mxu0 %v4229_v0 }
 0x356   :  { %3560 = vmatpush3.bf16.msra.mxu0 %v4357_v28 }
 0x357   :  { %3561 = vmatprep.subr.bf16.mxu0 %v4229_v0 }
 0x35a   :  { %3563 = vmatpush3.bf16.msra.mxu0 %v4361_v34 }
 0x35b   :  { %3564 = vmatprep.subr.bf16.mxu0 %v4229_v0 }
 0x35e   :  { %3566 = vmatpush3.bf16.msra.mxu0 %v4365_v40 }
 0x35f   :  { %3567 = vmatprep.subr.bf16.mxu0 %v4229_v0 }
 0x362   :  { %3569 = vmatpush3.bf16.msra.mxu0 %v4369_v46 }
 0x363   :  { %3570 = vmatprep.subr.bf16.mxu0 %v4229_v0 }
 0x366   :  { %3572 = vmatpush3.bf16.msra.mxu0 %v4373_v50 }
 0x367   :  { %3597 = vmatprep.subr.bf16.mxu0 %v4229_v0 }
 0x41c   :  { %v733_v41 = vpop.f32.mrb[18].mxu0 }
 0x41d   :  { %v738_v42 = vrot.slane %v733_v41, 5  ;;  %v739_v44 = vrot.slane %v733_v41, 6  ;;  %v740_v45 = vrot.slane %v733_v41, 7  ;;  %v741_v47 = vrot.slane %v733_v41, 1  ;;  %v2941_v48 = vpop.f32.mrb[19].mxu0 }
 0x41e   :  { %v756_v49 = vadd.f32 %v733_v41, %v4433_v31  ;;  %v742_v52 = vrot.slane %v733_v41, 2  ;;  %v743_v54 = vrot.slane %v733_v41, 3  ;;  %v744_v60 = vrot.slane %v733_v41, 4 }
 0x41f   :  { %v753_v55 = vadd.f32 %v738_v42, %v4438_v38  ;;  %v754_v56 = vadd.f32 %v739_v44, %v4427_v23  ;;  %v755_v58 = vadd.f32 %v740_v45, %v4429_v26  ;;  %v757_v61 = vadd.f32 %v741_v47, %v4435_v33 }
 0x420   :  { %3895 = vtanh.f32 %v756_v49  ;;  %v758_v62 = vadd.f32 %v742_v52, %v4443_v43  ;;  %v759_v63 = vadd.f32 %v743_v54, %v4451_v53  ;;  %v760_v2 = vadd.f32 %v744_v60, %v4456_v59 }
 0x421   :  { %3897 = vtanh.f32 %v753_v55 }
 0x422   :  { %3899 = vtanh.f32 %v754_v56 }
 0x423   :  { %3901 = vtanh.f32 %v755_v58 }
 0x424   :  { %3903 = vtanh.f32 %v757_v61 }
 0x425   :  { %3905 = vtanh.f32 %v758_v62 }
 0x426   :  { %3907 = vtanh.f32 %v759_v63 }
 0x427   :  { %3909 = vtanh.f32 %v760_v2 }
 0x42a   :  { %v3896_v3 = vpop.eup %3895 }
 0x42b   :  { %v3898_v5 = vpop.eup %3897 }
 0x42c   :  { %v3900_v8 = vpop.eup %3899  ;;  %v777_v9 = vrot.slane %v3898_v5, 3 }
 0x42d   :  { %v3902_v11 = vpop.eup %3901  ;;  %v778_v13 = vrot.slane %v3900_v8, 2 }
 0x42e   :  { %v3904_v14 = vpop.eup %3903  ;;  %v780_v4 = vrot.slane %v3902_v11, 1 }
 0x42f   :  { %v3906_v6 = vpop.eup %3905  ;;  %v779_v17 = vsel %vm396_vm1, %v778_v13, %v777_v9  ;;  %v783_v22 = vrot.slane %v3904_v14, 7 }
 0x430   :  { %v3908_v18 = vpop.eup %3907  ;;  %v781_v20 = vsel %vm399_vm2, %v780_v4, %v779_v17  ;;  %v785_v29 = vrot.slane %v3906_v6, 6 }
 0x431   :  { %v3910_v24 = vpop.eup %3909  ;;  %v782_v25 = vsel %vm402_vm3, %v3896_v3, %v781_v20  ;;  %v787_v32 = vrot.slane %v3908_v18, 5 }
 0x432   :  { %v784_v30 = vsel %vm405_vm4, %v783_v22, %v782_v25  ;;  %v789_v36 = vrot.slane %v3910_v24, 4 }
 0x433   :  { %v786_v35 = vsel %vm408_vm5, %v785_v29, %v784_v30 }
 0x434   :  { %v788_v37 = vsel %vm411_vm6, %v787_v32, %v786_v35 }
 0x435   :  { %v790_v41 = vsel %vm414_vm7, %v789_v36, %v788_v37 }
 0x436   :  { %2975 = vmatmul.mubr.f32.vlgmr.msra.gmra.mrb[4].mxu1 %v790_v41 }
 0x437   :  { %3575 = vmatpush3.bf16.msra.mxu1 %v4346_v10  ;;  %3044 = vmatprep.mubr.msk.f32.mxu1 %vm4230_vm0, %v4231_v1 }
 0x438   :  { %3576 = vmatprep.subr.bf16.mxu1 %v4229_v0 }
 0x43b   :  { %3578 = vmatpush3.bf16.msra.mxu1 %v4349_v15 }
 0x43c   :  { %3579 = vmatprep.subr.bf16.mxu1 %v4229_v0 }
 0x43f   :  { %3581 = vmatpush3.bf16.msra.mxu1 %v4353_v21 }
 0x440   :  { %3582 = vmatprep.subr.bf16.mxu1 %v4229_v0 }
 0x443   :  { %3584 = vmatpush3.bf16.msra.mxu1 %v4357_v28 }
 0x444   :  { %3585 = vmatprep.subr.bf16.mxu1 %v4229_v0 }
 0x447   :  { %3587 = vmatpush3.bf16.msra.mxu1 %v4361_v34 }
 0x448   :  { %3588 = vmatprep.subr.bf16.mxu1 %v4229_v0 }
 0x44b   :  { %3590 = vmatpush3.bf16.msra.mxu1 %v4365_v40 }
 0x44c   :  { %3591 = vmatprep.subr.bf16.mxu1 %v4229_v0 }
 0x44f   :  { %3593 = vmatpush3.bf16.msra.mxu1 %v4369_v46 }
 0x450   :  { %3594 = vmatprep.subr.bf16.mxu1 %v4229_v0 }
 0x453   :  { %3596 = vmatpush3.bf16.msra.mxu1 %v4373_v50 }
 0x454   :  { %3621 = vmatprep.subr.bf16.mxu1 %v4229_v0 }
 0x509   :  { %v858_v42 = vpop.f32.mrb[4].mxu1 }
 0x50a   :  { %v863_v44 = vrot.slane %v858_v42, 4  ;;  %v864_v45 = vrot.slane %v858_v42, 5  ;;  %v865_v47 = vrot.slane %v858_v42, 6  ;;  %v866_v48 = vrot.slane %v858_v42, 7  ;;  %v2976_v49 = vpop.f32.mrb[5].mxu1 }
 0x50b   :  { %v882_v52 = vadd.f32 %v858_v42, %v4435_v33  ;;  %v867_v54 = vrot.slane %v858_v42, 1  ;;  %v868_v55 = vrot.slane %v858_v42, 2  ;;  %v869_v61 = vrot.slane %v858_v42, 3 }
 0x50c   :  { %v878_v56 = vadd.f32 %v863_v44, %v4438_v38  ;;  %v879_v58 = vadd.f32 %v864_v45, %v4427_v23  ;;  %v880_v60 = vadd.f32 %v865_v47, %v4429_v26  ;;  %v881_v62 = vadd.f32 %v866_v48, %v4433_v31 }
 0x50d   :  { %3911 = vtanh.f32 %v882_v52  ;;  %v883_v63 = vadd.f32 %v867_v54, %v4443_v43  ;;  %v884_v2 = vadd.f32 %v868_v55, %v4451_v53  ;;  %v885_v3 = vadd.f32 %v869_v61, %v4456_v59 }
 0x50e   :  { %3913 = vtanh.f32 %v878_v56 }
 0x50f   :  { %3915 = vtanh.f32 %v879_v58 }
 0x510   :  { %3917 = vtanh.f32 %v880_v60 }
 0x511   :  { %3919 = vtanh.f32 %v881_v62 }
 0x512   :  { %3921 = vtanh.f32 %v883_v63 }
 0x513   :  { %3923 = vtanh.f32 %v884_v2 }
 0x514   :  { %3925 = vtanh.f32 %v885_v3 }
 0x517   :  { %v3912_v5 = vpop.eup %3911 }
 0x518   :  { %v3914_v8 = vpop.eup %3913 }
 0x519   :  { %v3916_v9 = vpop.eup %3915  ;;  %v902_v11 = vrot.slane %v3914_v8, 4 }
 0x51a   :  { %v3918_v13 = vpop.eup %3917  ;;  %v903_v14 = vrot.slane %v3916_v9, 3 }
 0x51b   :  { %v3920_v4 = vpop.eup %3919  ;;  %v905_v6 = vrot.slane %v3918_v13, 2 }
 0x51c   :  { %v3922_v17 = vpop.eup %3921  ;;  %v904_v18 = vsel %vm396_vm1, %v903_v14, %v902_v11  ;;  %v907_v20 = vrot.slane %v3920_v4, 1 }
 0x51d   :  { %v3924_v22 = vpop.eup %3923  ;;  %v906_v24 = vsel %vm399_vm2, %v905_v6, %v904_v18  ;;  %v910_v30 = vrot.slane %v3922_v17, 7 }
 0x51e   :  { %v3926_v25 = vpop.eup %3925  ;;  %v908_v29 = vsel %vm402_vm3, %v907_v20, %v906_v24  ;;  %v912_v35 = vrot.slane %v3924_v22, 6 }
 0x51f   :  { %v909_v32 = vsel %vm405_vm4, %v3912_v5, %v908_v29  ;;  %v914_v37 = vrot.slane %v3926_v25, 5 }
 0x520   :  { %v911_v36 = vsel %vm408_vm5, %v910_v30, %v909_v32 }
 0x521   :  { %v913_v41 = vsel %vm411_vm6, %v912_v35, %v911_v36 }
 0x522   :  { %v915_v42 = vsel %vm414_vm7, %v914_v37, %v913_v41 }
 0x523   :  { %3010 = vmatmul.mubr.f32.vlgmr.msra.gmra.mrb[20].mxu0 %v915_v42 }
 0x524   :  { %3599 = vmatpush3.bf16.msra.mxu0 %v4346_v10  ;;  %3079 = vmatprep.mubr.msk.f32.mxu0 %vm4230_vm0, %v4231_v1 }
 0x525   :  { %3600 = vmatprep.subr.bf16.mxu0 %v4229_v0 }
 0x528   :  { %3602 = vmatpush3.bf16.msra.mxu0 %v4349_v15 }
 0x529   :  { %3603 = vmatprep.subr.bf16.mxu0 %v4229_v0 }
 0x52c   :  { %3605 = vmatpush3.bf16.msra.mxu0 %v4353_v21 }
 0x52d   :  { %3606 = vmatprep.subr.bf16.mxu0 %v4229_v0 }
 0x530   :  { %3608 = vmatpush3.bf16.msra.mxu0 %v4357_v28 }
 0x531   :  { %3609 = vmatprep.subr.bf16.mxu0 %v4229_v0 }
 0x534   :  { %3611 = vmatpush3.bf16.msra.mxu0 %v4361_v34 }
 0x535   :  { %3612 = vmatprep.subr.bf16.mxu0 %v4229_v0 }
 0x538   :  { %3614 = vmatpush3.bf16.msra.mxu0 %v4365_v40 }
 0x539   :  { %3615 = vmatprep.subr.bf16.mxu0 %v4229_v0 }
 0x53c   :  { %3617 = vmatpush3.bf16.msra.mxu0 %v4369_v46 }
 0x53d   :  { %3618 = vmatprep.subr.bf16.mxu0 %v4229_v0 }
 0x540   :  { %3620 = vmatpush3.bf16.msra.mxu0 %v4373_v50 }
 0x541   :  { %3645 = vmatprep.subr.bf16.mxu0 %v4229_v0 }
 0x5f6   :  { %v983_v1 = vpop.f32.mrb[20].mxu0 }
 0x5f7   :  { %v988_v44 = vrot.slane %v983_v1, 3  ;;  %v989_v45 = vrot.slane %v983_v1, 4  ;;  %v990_v47 = vrot.slane %v983_v1, 5  ;;  %v991_v48 = vrot.slane %v983_v1, 6  ;;  %v3011_v49 = vpop.f32.mrb[21].mxu0 }
 0x5f8   :  { %v992_v52 = vrot.slane %v983_v1, 7  ;;  %v993_v54 = vrot.slane %v983_v1, 1  ;;  %v994_v60 = vrot.slane %v983_v1, 2  ;;  %v1008_v3 = vadd.f32 %v983_v1, %v4443_v43  ;;  %v4632_v1 = vld [vmem:[#allocation2] sm:$0xff] }
 0x5f9   :  { %v1003_v55 = vadd.f32 %v988_v44, %v4438_v38  ;;  %v1004_v56 = vadd.f32 %v989_v45, %v4427_v23  ;;  %v1005_v58 = vadd.f32 %v990_v47, %v4429_v26  ;;  %v1006_v61 = vadd.f32 %v991_v48, %v4433_v31 }
 0x5fa   :  { %v1007_v62 = vadd.f32 %v992_v52, %v4435_v33  ;;  %v1009_v63 = vadd.f32 %v993_v54, %v4451_v53  ;;  %v1010_v2 = vadd.f32 %v994_v60, %v4456_v59 }
 0x5fb   :  { %3927 = vtanh.f32 %v1003_v55 }
 0x5fc   :  { %3929 = vtanh.f32 %v1004_v56 }
 0x5fd   :  { %3931 = vtanh.f32 %v1005_v58 }
 0x5fe   :  { %3933 = vtanh.f32 %v1006_v61 }
 0x5ff   :  { %3935 = vtanh.f32 %v1007_v62 }
 0x600   :  { %3937 = vtanh.f32 %v1009_v63 }
 0x601   :  { %3939 = vtanh.f32 %v1010_v2 }
 0x602   :  { %3941 = vtanh.f32 %v1008_v3 }
 0x605   :  { %v3928_v5 = vpop.eup %3927 }
 0x606   :  { %v3930_v8 = vpop.eup %3929  ;;  %v1027_v9 = vrot.slane %v3928_v5, 5 }
 0x607   :  { %v3932_v11 = vpop.eup %3931  ;;  %v1028_v13 = vrot.slane %v3930_v8, 4 }
 0x608   :  { %v3934_v14 = vpop.eup %3933  ;;  %v1030_v4 = vrot.slane %v3932_v11, 3 }
 0x609   :  { %v3936_v6 = vpop.eup %3935  ;;  %v1029_v17 = vsel %vm396_vm1, %v1028_v13, %v1027_v9  ;;  %v1032_v18 = vrot.slane %v3934_v14, 2 }
 0x60a   :  { %v3938_v20 = vpop.eup %3937  ;;  %v1031_v22 = vsel %vm399_vm2, %v1030_v4, %v1029_v17  ;;  %v1034_v24 = vrot.slane %v3936_v6, 1 }
 0x60b   :  { %v3940_v25 = vpop.eup %3939  ;;  %v1033_v29 = vsel %vm402_vm3, %v1032_v18, %v1031_v22  ;;  %v1037_v35 = vrot.slane %v3938_v20, 7 }
 0x60c   :  { %v3942_v30 = vpop.eup %3941  ;;  %v1035_v32 = vsel %vm405_vm4, %v1034_v24, %v1033_v29  ;;  %v1039_v37 = vrot.slane %v3940_v25, 6 }
 0x60d   :  { %v1036_v36 = vsel %vm408_vm5, %v3942_v30, %v1035_v32 }
 0x60e   :  { %v1038_v41 = vsel %vm411_vm6, %v1037_v35, %v1036_v36 }
 0x60f   :  { %v1040_v42 = vsel %vm414_vm7, %v1039_v37, %v1038_v41 }
 0x610   :  { %3045 = vmatmul.mubr.f32.vlgmr.msra.gmra.mrb[6].mxu1 %v1040_v42 }
 0x611   :  { %3623 = vmatpush3.bf16.msra.mxu1 %v4346_v10  ;;  %3114 = vmatprep.mubr.msk.f32.mxu1 %vm4230_vm0, %v4632_v1 }
 0x612   :  { %3624 = vmatprep.subr.bf16.mxu1 %v4229_v0 }
 0x615   :  { %3626 = vmatpush3.bf16.msra.mxu1 %v4349_v15 }
 0x616   :  { %3627 = vmatprep.subr.bf16.mxu1 %v4229_v0 }
 0x619   :  { %3629 = vmatpush3.bf16.msra.mxu1 %v4353_v21 }
 0x61a   :  { %3630 = vmatprep.subr.bf16.mxu1 %v4229_v0 }
 0x61d   :  { %3632 = vmatpush3.bf16.msra.mxu1 %v4357_v28 }
 0x61e   :  { %3633 = vmatprep.subr.bf16.mxu1 %v4229_v0 }
 0x621   :  { %3635 = vmatpush3.bf16.msra.mxu1 %v4361_v34 }
 0x622   :  { %3636 = vmatprep.subr.bf16.mxu1 %v4229_v0 }
 0x625   :  { %3638 = vmatpush3.bf16.msra.mxu1 %v4365_v40 }
 0x626   :  { %3639 = vmatprep.subr.bf16.mxu1 %v4229_v0 }
 0x629   :  { %3641 = vmatpush3.bf16.msra.mxu1 %v4369_v46 }
 0x62a   :  { %3642 = vmatprep.subr.bf16.mxu1 %v4229_v0 }
 0x62d   :  { %3644 = vmatpush3.bf16.msra.mxu1 %v4373_v50 }
 0x62e   :  { %3669 = vmatprep.subr.bf16.mxu1 %v4229_v0 }
 0x6e3   :  { %v1108_v44 = vpop.f32.mrb[6].mxu1 }
 0x6e4   :  { %v1113_v45 = vrot.slane %v1108_v44, 2  ;;  %v1114_v47 = vrot.slane %v1108_v44, 3  ;;  %v1115_v48 = vrot.slane %v1108_v44, 4  ;;  %v1116_v49 = vrot.slane %v1108_v44, 5  ;;  %v3046_v52 = vpop.f32.mrb[7].mxu1 }
 0x6e5   :  { %v1117_v54 = vrot.slane %v1108_v44, 6  ;;  %v1118_v55 = vrot.slane %v1108_v44, 7  ;;  %v1119_v61 = vrot.slane %v1108_v44, 1  ;;  %v1134_v5 = vadd.f32 %v1108_v44, %v4451_v53 }
 0x6e6   :  { %v1128_v56 = vadd.f32 %v1113_v45, %v4438_v38  ;;  %v1129_v58 = vadd.f32 %v1114_v47, %v4427_v23  ;;  %v1130_v60 = vadd.f32 %v1115_v48, %v4429_v26  ;;  %v1131_v62 = vadd.f32 %v1116_v49, %v4433_v31 }
 0x6e7   :  { %v1132_v63 = vadd.f32 %v1117_v54, %v4435_v33  ;;  %v1133_v2 = vadd.f32 %v1118_v55, %v4443_v43  ;;  %v1135_v3 = vadd.f32 %v1119_v61, %v4456_v59 }
 0x6e8   :  { %3943 = vtanh.f32 %v1128_v56 }
 0x6e9   :  { %3945 = vtanh.f32 %v1129_v58 }
 0x6ea   :  { %3947 = vtanh.f32 %v1130_v60 }
 0x6eb   :  { %3949 = vtanh.f32 %v1131_v62 }
 0x6ec   :  { %3951 = vtanh.f32 %v1132_v63 }
 0x6ed   :  { %3953 = vtanh.f32 %v1133_v2 }
 0x6ee   :  { %3955 = vtanh.f32 %v1135_v3 }
 0x6ef   :  { %3957 = vtanh.f32 %v1134_v5 }
 0x6f2   :  { %v3944_v8 = vpop.eup %3943 }
 0x6f3   :  { %v3946_v9 = vpop.eup %3945  ;;  %v1152_v11 = vrot.slane %v3944_v8, 6 }
 0x6f4   :  { %v3948_v13 = vpop.eup %3947  ;;  %v1153_v14 = vrot.slane %v3946_v9, 5 }
 0x6f5   :  { %v3950_v4 = vpop.eup %3949  ;;  %v1155_v6 = vrot.slane %v3948_v13, 4 }
 0x6f6   :  { %v3952_v17 = vpop.eup %3951  ;;  %v1154_v18 = vsel %vm396_vm1, %v1153_v14, %v1152_v11  ;;  %v1157_v20 = vrot.slane %v3950_v4, 3 }
 0x6f7   :  { %v3954_v22 = vpop.eup %3953  ;;  %v1156_v24 = vsel %vm399_vm2, %v1155_v6, %v1154_v18  ;;  %v1159_v25 = vrot.slane %v3952_v17, 2 }
 0x6f8   :  { %v3956_v29 = vpop.eup %3955  ;;  %v1158_v30 = vsel %vm402_vm3, %v1157_v20, %v1156_v24  ;;  %v1161_v32 = vrot.slane %v3954_v22, 1 }
 0x6f9   :  { %v1160_v35 = vsel %vm405_vm4, %v1159_v25, %v1158_v30  ;;  %v3958_v36 = vpop.eup %3957  ;;  %v1164_v41 = vrot.slane %v3956_v29, 7 }
 0x6fa   :  { %v1162_v37 = vsel %vm408_vm5, %v1161_v32, %v1160_v35 }
 0x6fb   :  { %v1163_v42 = vsel %vm411_vm6, %v3958_v36, %v1162_v37 }
 0x6fc   :  { %v1165_v44 = vsel %vm414_vm7, %v1164_v41, %v1163_v42 }
 0x6fd   :  { %3080 = vmatmul.mubr.f32.vlgmr.msra.gmra.mrb[22].mxu0 %v1165_v44 }
 0x6fe   :  { %3647 = vmatpush3.bf16.msra.mxu0 %v4346_v10  ;;  %3149 = vmatprep.mubr.msk.f32.mxu0 %vm4230_vm0, %v4632_v1 }
 0x6ff   :  { %3648 = vmatprep.subr.bf16.mxu0 %v4229_v0 }
 0x702   :  { %3650 = vmatpush3.bf16.msra.mxu0 %v4349_v15 }
 0x703   :  { %3651 = vmatprep.subr.bf16.mxu0 %v4229_v0 }
 0x706   :  { %3653 = vmatpush3.bf16.msra.mxu0 %v4353_v21 }
 0x707   :  { %3654 = vmatprep.subr.bf16.mxu0 %v4229_v0 }
 0x70a   :  { %3656 = vmatpush3.bf16.msra.mxu0 %v4357_v28 }
 0x70b   :  { %3657 = vmatprep.subr.bf16.mxu0 %v4229_v0 }
 0x70e   :  { %3659 = vmatpush3.bf16.msra.mxu0 %v4361_v34 }
 0x70f   :  { %3660 = vmatprep.subr.bf16.mxu0 %v4229_v0 }
 0x712   :  { %3662 = vmatpush3.bf16.msra.mxu0 %v4365_v40 }
 0x713   :  { %3663 = vmatprep.subr.bf16.mxu0 %v4229_v0 }
 0x716   :  { %3665 = vmatpush3.bf16.msra.mxu0 %v4369_v46 }
 0x717   :  { %3666 = vmatprep.subr.bf16.mxu0 %v4229_v0 }
 0x71a   :  { %3668 = vmatpush3.bf16.msra.mxu0 %v4373_v50 }
 0x71b   :  { %3693 = vmatprep.subr.bf16.mxu0 %v4229_v0 }
 0x7d0   :  { %v1233_v45 = vpop.f32.mrb[22].mxu0 }
 0x7d1   :  { %v1238_v47 = vrot.slane %v1233_v45, 1  ;;  %v1239_v48 = vrot.slane %v1233_v45, 2  ;;  %v1240_v49 = vrot.slane %v1233_v45, 3  ;;  %v1241_v52 = vrot.slane %v1233_v45, 4  ;;  %v3081_v54 = vpop.f32.mrb[23].mxu0 }
 0x7d2   :  { %v1242_v55 = vrot.slane %v1233_v45, 5  ;;  %v1243_v56 = vrot.slane %v1233_v45, 6  ;;  %v1244_v62 = vrot.slane %v1233_v45, 7 }
 0x7d3   :  { %v1253_v58 = vadd.f32 %v1238_v47, %v4438_v38  ;;  %v1254_v60 = vadd.f32 %v1239_v48, %v4427_v23  ;;  %v1255_v61 = vadd.f32 %v1240_v49, %v4429_v26  ;;  %v1256_v63 = vadd.f32 %v1241_v52, %v4433_v31 }
 0x7d4   :  { %v1257_v2 = vadd.f32 %v1242_v55, %v4435_v33  ;;  %v1258_v3 = vadd.f32 %v1243_v56, %v4443_v43  ;;  %v1259_v5 = vadd.f32 %v1244_v62, %v4451_v53  ;;  %v1260_v38 = vadd.f32 %v1233_v45, %v4456_v59 }
 0x7d5   :  { %3959 = vtanh.f32 %v1253_v58 }
 0x7d6   :  { %3961 = vtanh.f32 %v1254_v60 }
 0x7d7   :  { %3963 = vtanh.f32 %v1255_v61 }
 0x7d8   :  { %3965 = vtanh.f32 %v1256_v63 }
 0x7d9   :  { %3967 = vtanh.f32 %v1257_v2 }
 0x7da   :  { %3969 = vtanh.f32 %v1258_v3 }
 0x7db   :  { %3971 = vtanh.f32 %v1259_v5 }
 0x7dc   :  { %3973 = vtanh.f32 %v1260_v38 }
 0x7df   :  { %v3960_v23 = vpop.eup %3959 }
 0x7e0   :  { %v3962_v26 = vpop.eup %3961  ;;  %v1277_v8 = vrot.slane %v3960_v23, 7 }
 0x7e1   :  { %v3964_v31 = vpop.eup %3963  ;;  %v1278_v9 = vrot.slane %v3962_v26, 6 }
 0x7e2   :  { %v3966_v11 = vpop.eup %3965  ;;  %v1280_v33 = vrot.slane %v3964_v31, 5 }
 0x7e3   :  { %v3968_v13 = vpop.eup %3967  ;;  %v1279_v43 = vsel %vm396_vm1, %v1278_v9, %v1277_v8  ;;  %v1282_v14 = vrot.slane %v3966_v11, 4 }
 0x7e4   :  { %v3970_v53 = vpop.eup %3969  ;;  %v1281_v4 = vsel %vm399_vm2, %v1280_v33, %v1279_v43  ;;  %v1284_v6 = vrot.slane %v3968_v13, 3 }
 0x7e5   :  { %v3972_v17 = vpop.eup %3971  ;;  %v1283_v59 = vsel %vm402_vm3, %v1282_v14, %v1281_v4  ;;  %v1286_v18 = vrot.slane %v3970_v53, 2 }
 0x7e6   :  { %v1285_v20 = vsel %vm405_vm4, %v1284_v6, %v1283_v59  ;;  %v1288_v22 = vrot.slane %v3972_v17, 1  ;;  %v3974_v25 = vpop.eup %3973 }
 0x7e7   :  { %v1287_v24 = vsel %vm408_vm5, %v1286_v18, %v1285_v20 }
 0x7e8   :  { %v1289_v29 = vsel %vm411_vm6, %v1288_v22, %v1287_v24 }
 0x7e9   :  { %v1290_v30 = vsel %vm414_vm7, %v3974_v25, %v1289_v29 }
 0x7ea   :  { %3115 = vmatmul.mubr.f32.vlgmr.msra.gmra.mrb[8].mxu1 %v1290_v30 }
 0x7eb   :  { %3671 = vmatpush3.bf16.msra.mxu1 %v4346_v10  ;;  %3184 = vmatprep.mubr.msk.f32.mxu1 %vm4230_vm0, %v4632_v1 }
 0x7ec   :  { %3672 = vmatprep.subr.bf16.mxu1 %v4229_v0 }
 0x7ef   :  { %3674 = vmatpush3.bf16.msra.mxu1 %v4349_v15 }
 0x7f0   :  { %3675 = vmatprep.subr.bf16.mxu1 %v4229_v0 }
 0x7f3   :  { %3677 = vmatpush3.bf16.msra.mxu1 %v4353_v21 }
 0x7f4   :  { %3678 = vmatprep.subr.bf16.mxu1 %v4229_v0 }
 0x7f7   :  { %3680 = vmatpush3.bf16.msra.mxu1 %v4357_v28 }
 0x7f8   :  { %3681 = vmatprep.subr.bf16.mxu1 %v4229_v0 }
 0x7fb   :  { %3683 = vmatpush3.bf16.msra.mxu1 %v4361_v34 }
 0x7fc   :  { %3684 = vmatprep.subr.bf16.mxu1 %v4229_v0 }
 0x7ff   :  { %3686 = vmatpush3.bf16.msra.mxu1 %v4365_v40 }
 0x800   :  { %3687 = vmatprep.subr.bf16.mxu1 %v4229_v0 }
 0x803   :  { %3689 = vmatpush3.bf16.msra.mxu1 %v4369_v46 }
 0x804   :  { %3690 = vmatprep.subr.bf16.mxu1 %v4229_v0 }
 0x807   :  { %3692 = vmatpush3.bf16.msra.mxu1 %v4373_v50 }
 0x808   :  { %3717 = vmatprep.subr.bf16.mxu1 %v4229_v0 }
 0x8bd   :  { %v1358_v32 = vpop.f32.mrb[8].mxu1 }
 0x8be   :  { %v1363_v35 = vrot.slane %v1358_v32, 1  ;;  %v1364_v36 = vrot.slane %v1358_v32, 2  ;;  %v1365_v37 = vrot.slane %v1358_v32, 3  ;;  %v1366_v41 = vrot.slane %v1358_v32, 4  ;;  %v3116_v42 = vpop.f32.mrb[9].mxu1 }
 0x8bf   :  { %v1378_v44 = vadd.f32 %v1358_v32, %v4419_v7  ;;  %v1367_v45 = vrot.slane %v1358_v32, 5  ;;  %v1368_v47 = vrot.slane %v1358_v32, 6  ;;  %v1369_v52 = vrot.slane %v1358_v32, 7 }
 0x8c0   :  { %v1379_v48 = vadd.f32 %v1363_v35, %v4421_v12  ;;  %v1380_v49 = vadd.f32 %v1364_v36, %v4423_v16  ;;  %v1381_v54 = vadd.f32 %v1365_v37, %v4425_v19  ;;  %v1382_v55 = vadd.f32 %v1366_v41, %v4431_v27 }
 0x8c1   :  { %3975 = vtanh.f32 %v1378_v44  ;;  %v1383_v56 = vadd.f32 %v1367_v45, %v4440_v39  ;;  %v1384_v58 = vadd.f32 %v1368_v47, %v4449_v51  ;;  %v1385_v60 = vadd.f32 %v1369_v52, %v4454_v57 }
 0x8c2   :  { %3977 = vtanh.f32 %v1379_v48 }
 0x8c3   :  { %3979 = vtanh.f32 %v1380_v49 }
 0x8c4   :  { %3981 = vtanh.f32 %v1381_v54 }
 0x8c5   :  { %3983 = vtanh.f32 %v1382_v55 }
 0x8c6   :  { %3985 = vtanh.f32 %v1383_v56 }
 0x8c7   :  { %3987 = vtanh.f32 %v1384_v58 }
 0x8c8   :  { %3989 = vtanh.f32 %v1385_v60 }
 0x8cb   :  { %v3976_v61 = vpop.eup %3975 }
 0x8cc   :  { %v3978_v62 = vpop.eup %3977 }
 0x8cd   :  { %v3980_v63 = vpop.eup %3979  ;;  %v1402_v2 = vrot.slane %v3978_v62, 7 }
 0x8ce   :  { %v3982_v3 = vpop.eup %3981  ;;  %v1404_v5 = vrot.slane %v3980_v63, 6 }
 0x8cf   :  { %v3984_v38 = vpop.eup %3983  ;;  %v1403_v23 = vsel %vm396_vm1, %v1402_v2, %v3976_v61  ;;  %v1406_v26 = vrot.slane %v3982_v3, 5 }
 0x8d0   :  { %v3986_v8 = vpop.eup %3985  ;;  %v1405_v31 = vsel %vm399_vm2, %v1404_v5, %v1403_v23  ;;  %v1408_v9 = vrot.slane %v3984_v38, 4 }
 0x8d1   :  { %v3988_v11 = vpop.eup %3987  ;;  %v1407_v33 = vsel %vm402_vm3, %v1406_v26, %v1405_v31  ;;  %v1410_v13 = vrot.slane %v3986_v8, 3 }
 0x8d2   :  { %v3990_v43 = vpop.eup %3989  ;;  %v1409_v14 = vsel %vm405_vm4, %v1408_v9, %v1407_v33  ;;  %v1412_v53 = vrot.slane %v3988_v11, 2 }
 0x8d3   :  { %v1411_v4 = vsel %vm408_vm5, %v1410_v13, %v1409_v14  ;;  %v1414_v6 = vrot.slane %v3990_v43, 1 }
 0x8d4   :  { %v1413_v17 = vsel %vm411_vm6, %v1412_v53, %v1411_v4 }
 0x8d5   :  { %v1415_v59 = vsel %vm414_vm7, %v1414_v6, %v1413_v17 }
 0x8d6   :  { %3150 = vmatmul.mubr.f32.vlgmr.msra.gmra.mrb[24].mxu0 %v1415_v59 }
 0x8d7   :  { %3695 = vmatpush3.bf16.msra.mxu0 %v4346_v10  ;;  %3219 = vmatprep.mubr.msk.f32.mxu0 %vm4230_vm0, %v4632_v1 }
 0x8d8   :  { %3696 = vmatprep.subr.bf16.mxu0 %v4229_v0 }
 0x8db   :  { %3698 = vmatpush3.bf16.msra.mxu0 %v4349_v15 }
 0x8dc   :  { %3699 = vmatprep.subr.bf16.mxu0 %v4229_v0 }
 0x8df   :  { %3701 = vmatpush3.bf16.msra.mxu0 %v4353_v21 }
 0x8e0   :  { %3702 = vmatprep.subr.bf16.mxu0 %v4229_v0 }
 0x8e3   :  { %3704 = vmatpush3.bf16.msra.mxu0 %v4357_v28 }
 0x8e4   :  { %3705 = vmatprep.subr.bf16.mxu0 %v4229_v0 }
 0x8e7   :  { %3707 = vmatpush3.bf16.msra.mxu0 %v4361_v34 }
 0x8e8   :  { %3708 = vmatprep.subr.bf16.mxu0 %v4229_v0 }
 0x8eb   :  { %3710 = vmatpush3.bf16.msra.mxu0 %v4365_v40 }
 0x8ec   :  { %3711 = vmatprep.subr.bf16.mxu0 %v4229_v0 }
 0x8ef   :  { %3713 = vmatpush3.bf16.msra.mxu0 %v4369_v46 }
 0x8f0   :  { %3714 = vmatprep.subr.bf16.mxu0 %v4229_v0 }
 0x8f3   :  { %3716 = vmatpush3.bf16.msra.mxu0 %v4373_v50 }
 0x8f4   :  { %3741 = vmatprep.subr.bf16.mxu0 %v4229_v0 }
 0x9a9   :  { %v1483_v18 = vpop.f32.mrb[24].mxu0 }
 0x9aa   :  { %v1488_v20 = vrot.slane %v1483_v18, 7  ;;  %v1489_v22 = vrot.slane %v1483_v18, 1  ;;  %v1490_v24 = vrot.slane %v1483_v18, 2  ;;  %v1491_v25 = vrot.slane %v1483_v18, 3  ;;  %v3151_v29 = vpop.f32.mrb[25].mxu0 }
 0x9ab   :  { %v1504_v30 = vadd.f32 %v1483_v18, %v4421_v12  ;;  %v1492_v32 = vrot.slane %v1483_v18, 4  ;;  %v1493_v35 = vrot.slane %v1483_v18, 5  ;;  %v1494_v41 = vrot.slane %v1483_v18, 6 }
 0x9ac   :  { %v1503_v36 = vadd.f32 %v1488_v20, %v4419_v7  ;;  %v1505_v37 = vadd.f32 %v1489_v22, %v4423_v16  ;;  %v1506_v42 = vadd.f32 %v1490_v24, %v4425_v19  ;;  %v1507_v44 = vadd.f32 %v1491_v25, %v4431_v27 }
 0x9ad   :  { %3991 = vtanh.f32 %v1504_v30  ;;  %v1508_v45 = vadd.f32 %v1492_v32, %v4440_v39  ;;  %v1509_v47 = vadd.f32 %v1493_v35, %v4449_v51  ;;  %v1510_v48 = vadd.f32 %v1494_v41, %v4454_v57 }
 0x9ae   :  { %3993 = vtanh.f32 %v1503_v36 }
 0x9af   :  { %3995 = vtanh.f32 %v1505_v37 }
 0x9b0   :  { %3997 = vtanh.f32 %v1506_v42 }
 0x9b1   :  { %3999 = vtanh.f32 %v1507_v44 }
 0x9b2   :  { %4001 = vtanh.f32 %v1508_v45 }
 0x9b3   :  { %4003 = vtanh.f32 %v1509_v47 }
 0x9b4   :  { %4005 = vtanh.f32 %v1510_v48 }
 0x9b7   :  { %v3992_v49 = vpop.eup %3991 }
 0x9b8   :  { %v3994_v52 = vpop.eup %3993 }
 0x9b9   :  { %v3996_v54 = vpop.eup %3995  ;;  %v1527_v55 = vrot.slane %v3994_v52, 1 }
 0x9ba   :  { %v3998_v56 = vpop.eup %3997  ;;  %v1529_v58 = vrot.slane %v3996_v54, 7 }
 0x9bb   :  { %v4000_v60 = vpop.eup %3999  ;;  %v1528_v61 = vsel %vm396_vm1, %v3992_v49, %v1527_v55  ;;  %v1531_v62 = vrot.slane %v3998_v56, 6 }
 0x9bc   :  { %v4002_v63 = vpop.eup %4001  ;;  %v1530_v2 = vsel %vm399_vm2, %v1529_v58, %v1528_v61  ;;  %v1533_v3 = vrot.slane %v4000_v60, 5 }
 0x9bd   :  { %v4004_v5 = vpop.eup %4003  ;;  %v1532_v38 = vsel %vm402_vm3, %v1531_v62, %v1530_v2  ;;  %v1535_v23 = vrot.slane %v4002_v63, 4 }
 0x9be   :  { %v4006_v26 = vpop.eup %4005  ;;  %v1534_v8 = vsel %vm405_vm4, %v1533_v3, %v1532_v38  ;;  %v1537_v31 = vrot.slane %v4004_v5, 3 }
 0x9bf   :  { %v1536_v9 = vsel %vm408_vm5, %v1535_v23, %v1534_v8  ;;  %v1539_v11 = vrot.slane %v4006_v26, 2 }
 0x9c0   :  { %v1538_v33 = vsel %vm411_vm6, %v1537_v31, %v1536_v9 }
 0x9c1   :  { %v1540_v13 = vsel %vm414_vm7, %v1539_v11, %v1538_v33 }
 0x9c2   :  { %3185 = vmatmul.mubr.f32.vlgmr.msra.gmra.mrb[10].mxu1 %v1540_v13 }
 0x9c3   :  { %3719 = vmatpush3.bf16.msra.mxu1 %v4346_v10  ;;  %3254 = vmatprep.mubr.msk.f32.mxu1 %vm4230_vm0, %v4632_v1 }
 0x9c4   :  { %3720 = vmatprep.subr.bf16.mxu1 %v4229_v0 }
 0x9c7   :  { %3722 = vmatpush3.bf16.msra.mxu1 %v4349_v15 }
 0x9c8   :  { %3723 = vmatprep.subr.bf16.mxu1 %v4229_v0 }
 0x9cb   :  { %3725 = vmatpush3.bf16.msra.mxu1 %v4353_v21 }
 0x9cc   :  { %3726 = vmatprep.subr.bf16.mxu1 %v4229_v0 }
 0x9cf   :  { %3728 = vmatpush3.bf16.msra.mxu1 %v4357_v28 }
 0x9d0   :  { %3729 = vmatprep.subr.bf16.mxu1 %v4229_v0 }
 0x9d3   :  { %3731 = vmatpush3.bf16.msra.mxu1 %v4361_v34 }
 0x9d4   :  { %3732 = vmatprep.subr.bf16.mxu1 %v4229_v0 }
 0x9d7   :  { %3734 = vmatpush3.bf16.msra.mxu1 %v4365_v40 }
 0x9d8   :  { %3735 = vmatprep.subr.bf16.mxu1 %v4229_v0 }
 0x9db   :  { %3737 = vmatpush3.bf16.msra.mxu1 %v4369_v46 }
 0x9dc   :  { %3738 = vmatprep.subr.bf16.mxu1 %v4229_v0 }
 0x9df   :  { %3740 = vmatpush3.bf16.msra.mxu1 %v4373_v50 }
 0x9e0   :  { %3765 = vmatprep.subr.bf16.mxu1 %v4229_v0 }
 0xa95   :  { %v1608_v43 = vpop.f32.mrb[10].mxu1 }
 0xa96   :  { %v1613_v14 = vrot.slane %v1608_v43, 6  ;;  %v1614_v53 = vrot.slane %v1608_v43, 7  ;;  %v1615_v4 = vrot.slane %v1608_v43, 1  ;;  %v1616_v6 = vrot.slane %v1608_v43, 2  ;;  %v3186_v17 = vpop.f32.mrb[11].mxu1 }
 0xa97   :  { %v1630_v59 = vadd.f32 %v1608_v43, %v4423_v16  ;;  %v1617_v18 = vrot.slane %v1608_v43, 3  ;;  %v1618_v20 = vrot.slane %v1608_v43, 4  ;;  %v1619_v25 = vrot.slane %v1608_v43, 5 }
 0xa98   :  { %v1628_v22 = vadd.f32 %v1613_v14, %v4419_v7  ;;  %v1629_v24 = vadd.f32 %v1614_v53, %v4421_v12  ;;  %v1631_v29 = vadd.f32 %v1615_v4, %v4425_v19  ;;  %v1632_v30 = vadd.f32 %v1616_v6, %v4431_v27 }
 0xa99   :  { %4007 = vtanh.f32 %v1630_v59  ;;  %v1633_v32 = vadd.f32 %v1617_v18, %v4440_v39  ;;  %v1634_v35 = vadd.f32 %v1618_v20, %v4449_v51  ;;  %v1635_v36 = vadd.f32 %v1619_v25, %v4454_v57 }
 0xa9a   :  { %4009 = vtanh.f32 %v1628_v22 }
 0xa9b   :  { %4011 = vtanh.f32 %v1629_v24 }
 0xa9c   :  { %4013 = vtanh.f32 %v1631_v29 }
 0xa9d   :  { %4015 = vtanh.f32 %v1632_v30 }
 0xa9e   :  { %4017 = vtanh.f32 %v1633_v32 }
 0xa9f   :  { %4019 = vtanh.f32 %v1634_v35 }
 0xaa0   :  { %4021 = vtanh.f32 %v1635_v36 }
 0xaa3   :  { %v4008_v37 = vpop.eup %4007 }
 0xaa4   :  { %v4010_v41 = vpop.eup %4009 }
 0xaa5   :  { %v4012_v42 = vpop.eup %4011  ;;  %v1652_v44 = vrot.slane %v4010_v41, 2 }
 0xaa6   :  { %v4014_v45 = vpop.eup %4013  ;;  %v1653_v47 = vrot.slane %v4012_v42, 1 }
 0xaa7   :  { %v4016_v48 = vpop.eup %4015  ;;  %v1656_v54 = vrot.slane %v4014_v45, 7 }
 0xaa8   :  { %v4018_v49 = vpop.eup %4017  ;;  %v1654_v52 = vsel %vm396_vm1, %v1653_v47, %v1652_v44  ;;  %v1658_v58 = vrot.slane %v4016_v48, 6 }
 0xaa9   :  { %v4020_v55 = vpop.eup %4019  ;;  %v1655_v56 = vsel %vm399_vm2, %v4008_v37, %v1654_v52  ;;  %v1660_v62 = vrot.slane %v4018_v49, 5 }
 0xaaa   :  { %v4022_v60 = vpop.eup %4021  ;;  %v1657_v61 = vsel %vm402_vm3, %v1656_v54, %v1655_v56  ;;  %v1662_v2 = vrot.slane %v4020_v55, 4 }
 0xaab   :  { %v1659_v63 = vsel %vm405_vm4, %v1658_v58, %v1657_v61  ;;  %v1664_v5 = vrot.slane %v4022_v60, 3 }
 0xaac   :  { %v1661_v3 = vsel %vm408_vm5, %v1660_v62, %v1659_v63 }
 0xaad   :  { %v1663_v38 = vsel %vm411_vm6, %v1662_v2, %v1661_v3 }
 0xaae   :  { %v1665_v23 = vsel %vm414_vm7, %v1664_v5, %v1663_v38 }
 0xaaf   :  { %3220 = vmatmul.mubr.f32.vlgmr.msra.gmra.mrb[26].mxu0 %v1665_v23 }
 0xab0   :  { %3743 = vmatpush3.bf16.msra.mxu0 %v4346_v10  ;;  %3289 = vmatprep.mubr.msk.f32.mxu0 %vm4230_vm0, %v4632_v1 }
 0xab1   :  { %3744 = vmatprep.subr.bf16.mxu0 %v4229_v0 }
 0xab4   :  { %3746 = vmatpush3.bf16.msra.mxu0 %v4349_v15 }
 0xab5   :  { %3747 = vmatprep.subr.bf16.mxu0 %v4229_v0 }
 0xab8   :  { %3749 = vmatpush3.bf16.msra.mxu0 %v4353_v21 }
 0xab9   :  { %3750 = vmatprep.subr.bf16.mxu0 %v4229_v0 }
 0xabc   :  { %3752 = vmatpush3.bf16.msra.mxu0 %v4357_v28 }
 0xabd   :  { %3753 = vmatprep.subr.bf16.mxu0 %v4229_v0 }
 0xac0   :  { %3755 = vmatpush3.bf16.msra.mxu0 %v4361_v34 }
 0xac1   :  { %3756 = vmatprep.subr.bf16.mxu0 %v4229_v0 }
 0xac4   :  { %3758 = vmatpush3.bf16.msra.mxu0 %v4365_v40 }
 0xac5   :  { %3759 = vmatprep.subr.bf16.mxu0 %v4229_v0 }
 0xac8   :  { %3761 = vmatpush3.bf16.msra.mxu0 %v4369_v46 }
 0xac9   :  { %3762 = vmatprep.subr.bf16.mxu0 %v4229_v0 }
 0xacc   :  { %3764 = vmatpush3.bf16.msra.mxu0 %v4373_v50 }
 0xacd   :  { %3789 = vmatprep.subr.bf16.mxu0 %v4229_v0 }
 0xb82   :  { %v1733_v26 = vpop.f32.mrb[26].mxu0 }
 0xb83   :  { %v1738_v8 = vrot.slane %v1733_v26, 5  ;;  %v1739_v31 = vrot.slane %v1733_v26, 6  ;;  %v1740_v9 = vrot.slane %v1733_v26, 7  ;;  %v1741_v11 = vrot.slane %v1733_v26, 1  ;;  %v3221_v33 = vpop.f32.mrb[27].mxu0 }
 0xb84   :  { %v1756_v13 = vadd.f32 %v1733_v26, %v4425_v19  ;;  %v1742_v43 = vrot.slane %v1733_v26, 2  ;;  %v1743_v14 = vrot.slane %v1733_v26, 3  ;;  %v1744_v17 = vrot.slane %v1733_v26, 4 }
 0xb85   :  { %v1753_v53 = vadd.f32 %v1738_v8, %v4419_v7  ;;  %v1754_v4 = vadd.f32 %v1739_v31, %v4421_v12  ;;  %v1755_v6 = vadd.f32 %v1740_v9, %v4423_v16  ;;  %v1757_v59 = vadd.f32 %v1741_v11, %v4431_v27 }
 0xb86   :  { %4023 = vtanh.f32 %v1756_v13  ;;  %v1758_v18 = vadd.f32 %v1742_v43, %v4440_v39  ;;  %v1759_v20 = vadd.f32 %v1743_v14, %v4449_v51  ;;  %v1760_v22 = vadd.f32 %v1744_v17, %v4454_v57 }
 0xb87   :  { %4025 = vtanh.f32 %v1753_v53 }
 0xb88   :  { %4027 = vtanh.f32 %v1754_v4 }
 0xb89   :  { %4029 = vtanh.f32 %v1755_v6 }
 0xb8a   :  { %4031 = vtanh.f32 %v1757_v59 }
 0xb8b   :  { %4033 = vtanh.f32 %v1758_v18 }
 0xb8c   :  { %4035 = vtanh.f32 %v1759_v20 }
 0xb8d   :  { %4037 = vtanh.f32 %v1760_v22 }
 0xb90   :  { %v4024_v24 = vpop.eup %4023 }
 0xb91   :  { %v4026_v25 = vpop.eup %4025 }
 0xb92   :  { %v4028_v29 = vpop.eup %4027  ;;  %v1777_v30 = vrot.slane %v4026_v25, 3 }
 0xb93   :  { %v4030_v32 = vpop.eup %4029  ;;  %v1778_v35 = vrot.slane %v4028_v29, 2 }
 0xb94   :  { %v4032_v36 = vpop.eup %4031  ;;  %v1780_v37 = vrot.slane %v4030_v32, 1 }
 0xb95   :  { %v4034_v41 = vpop.eup %4033  ;;  %v1779_v42 = vsel %vm396_vm1, %v1778_v35, %v1777_v30  ;;  %v1783_v47 = vrot.slane %v4032_v36, 7 }
 0xb96   :  { %v4036_v44 = vpop.eup %4035  ;;  %v1781_v45 = vsel %vm399_vm2, %v1780_v37, %v1779_v42  ;;  %v1785_v52 = vrot.slane %v4034_v41, 6 }
 0xb97   :  { %v4038_v48 = vpop.eup %4037  ;;  %v1782_v49 = vsel %vm402_vm3, %v4024_v24, %v1781_v45  ;;  %v1787_v55 = vrot.slane %v4036_v44, 5 }
 0xb98   :  { %v1784_v54 = vsel %vm405_vm4, %v1783_v47, %v1782_v49  ;;  %v1789_v58 = vrot.slane %v4038_v48, 4 }
 0xb99   :  { %v1786_v56 = vsel %vm408_vm5, %v1785_v52, %v1784_v54 }
 0xb9a   :  { %v1788_v60 = vsel %vm411_vm6, %v1787_v55, %v1786_v56 }
 0xb9b   :  { %v1790_v61 = vsel %vm414_vm7, %v1789_v58, %v1788_v60 }
 0xb9c   :  { %3255 = vmatmul.mubr.f32.vlgmr.msra.gmra.mrb[12].mxu1 %v1790_v61 }
 0xb9d   :  { %3767 = vmatpush3.bf16.msra.mxu1 %v4346_v10  ;;  %3324 = vmatprep.mubr.msk.f32.mxu1 %vm4230_vm0, %v4632_v1 }
 0xb9e   :  { %3768 = vmatprep.subr.bf16.mxu1 %v4229_v0 }
 0xba1   :  { %3770 = vmatpush3.bf16.msra.mxu1 %v4349_v15 }
 0xba2   :  { %3771 = vmatprep.subr.bf16.mxu1 %v4229_v0 }
 0xba5   :  { %3773 = vmatpush3.bf16.msra.mxu1 %v4353_v21 }
 0xba6   :  { %3774 = vmatprep.subr.bf16.mxu1 %v4229_v0 }
 0xba9   :  { %3776 = vmatpush3.bf16.msra.mxu1 %v4357_v28 }
 0xbaa   :  { %3777 = vmatprep.subr.bf16.mxu1 %v4229_v0 }
 0xbad   :  { %3779 = vmatpush3.bf16.msra.mxu1 %v4361_v34 }
 0xbae   :  { %3780 = vmatprep.subr.bf16.mxu1 %v4229_v0 }
 0xbb1   :  { %3782 = vmatpush3.bf16.msra.mxu1 %v4365_v40 }
 0xbb2   :  { %3783 = vmatprep.subr.bf16.mxu1 %v4229_v0 }
 0xbb5   :  { %3785 = vmatpush3.bf16.msra.mxu1 %v4369_v46 }
 0xbb6   :  { %3786 = vmatprep.subr.bf16.mxu1 %v4229_v0 }
 0xbb9   :  { %3788 = vmatpush3.bf16.msra.mxu1 %v4373_v50 }
 0xbba   :  { %3813 = vmatprep.subr.bf16.mxu1 %v4229_v0 }
 0xc6f   :  { %v1858_v62 = vpop.f32.mrb[12].mxu1 }
 0xc70   :  { %v1863_v63 = vrot.slane %v1858_v62, 4  ;;  %v1864_v2 = vrot.slane %v1858_v62, 5  ;;  %v1865_v3 = vrot.slane %v1858_v62, 6  ;;  %v1866_v5 = vrot.slane %v1858_v62, 7  ;;  %v3256_v38 = vpop.f32.mrb[13].mxu1 }
 0xc71   :  { %v1882_v23 = vadd.f32 %v1858_v62, %v4431_v27  ;;  %v1867_v26 = vrot.slane %v1858_v62, 1  ;;  %v1868_v8 = vrot.slane %v1858_v62, 2  ;;  %v1869_v33 = vrot.slane %v1858_v62, 3 }
 0xc72   :  { %v1878_v31 = vadd.f32 %v1863_v63, %v4419_v7  ;;  %v1879_v9 = vadd.f32 %v1864_v2, %v4421_v12  ;;  %v1880_v11 = vadd.f32 %v1865_v3, %v4423_v16  ;;  %v1881_v13 = vadd.f32 %v1866_v5, %v4425_v19 }
 0xc73   :  { %4039 = vtanh.f32 %v1882_v23  ;;  %v1883_v43 = vadd.f32 %v1867_v26, %v4440_v39  ;;  %v1884_v14 = vadd.f32 %v1868_v8, %v4449_v51  ;;  %v1885_v53 = vadd.f32 %v1869_v33, %v4454_v57 }
 0xc74   :  { %4041 = vtanh.f32 %v1878_v31 }
 0xc75   :  { %4043 = vtanh.f32 %v1879_v9 }
 0xc76   :  { %4045 = vtanh.f32 %v1880_v11 }
 0xc77   :  { %4047 = vtanh.f32 %v1881_v13 }
 0xc78   :  { %4049 = vtanh.f32 %v1883_v43 }
 0xc79   :  { %4051 = vtanh.f32 %v1884_v14 }
 0xc7a   :  { %4053 = vtanh.f32 %v1885_v53 }
 0xc7d   :  { %v4040_v4 = vpop.eup %4039 }
 0xc7e   :  { %v4042_v6 = vpop.eup %4041 }
 0xc7f   :  { %v4044_v17 = vpop.eup %4043  ;;  %v1902_v59 = vrot.slane %v4042_v6, 4 }
 0xc80   :  { %v4046_v18 = vpop.eup %4045  ;;  %v1903_v20 = vrot.slane %v4044_v17, 3 }
 0xc81   :  { %v4048_v22 = vpop.eup %4047  ;;  %v1905_v24 = vrot.slane %v4046_v18, 2 }
 0xc82   :  { %v4050_v25 = vpop.eup %4049  ;;  %v1904_v29 = vsel %vm396_vm1, %v1903_v20, %v1902_v59  ;;  %v1907_v30 = vrot.slane %v4048_v22, 1  ;;  %v4104_v22 = vld [vmem:[#allocation2] sm:$0xff] }
 0xc83   :  { %v4052_v32 = vpop.eup %4051  ;;  %v1906_v35 = vsel %vm399_vm2, %v1905_v24, %v1904_v29  ;;  %v1910_v41 = vrot.slane %v4050_v25, 7  ;;  %v2297_v24 = vld [vmem:[#allocation9] sm:$0xff]  ;;  %v2298_v25 = vld [vmem:[#allocation9 + $0x8] sm:$0xff]  ;;  %v2299_v29 = vld [vmem:[#allocation9 + $0x10] sm:$0xff] }
 0xc84   :  { %v4054_v36 = vpop.eup %4053  ;;  %v1908_v37 = vsel %vm402_vm3, %v1907_v30, %v1906_v35  ;;  %v1912_v44 = vrot.slane %v4052_v32, 6  ;;  %v3814_v30 = vpack.c.bf16 %v2298_v25, %v2297_v24  ;;  %v2300_v32 = vld [vmem:[#allocation9 + $0x18] sm:$0xff] }
 0xc85   :  { %v1909_v42 = vsel %vm405_vm4, %v4040_v4, %v1908_v37  ;;  %v1914_v47 = vrot.slane %v4054_v36, 5  ;;  %v3817_v35 = vpack.c.bf16 %v2300_v32, %v2299_v29  ;;  %v2308_v24 = vld [vmem:[#allocation9 + $0x58] sm:$0xff]  ;;  %v2309_v29 = vld [vmem:[#allocation9 + $0x60] sm:$0xff] }
 0xc86   :  { %v1911_v45 = vsel %vm408_vm5, %v1910_v41, %v1909_v42 }
 0xc87   :  { %v1913_v48 = vsel %vm411_vm6, %v1912_v44, %v1911_v45 }
 0xc88   :  { %v1915_v49 = vsel %vm414_vm7, %v1914_v47, %v1913_v48 }
 0xc89   :  { %3290 = vmatmul.mubr.f32.vlgmr.msra.gmra.mrb[28].mxu0 %v1915_v49 }
 0xc8a   :  { %3791 = vmatpush3.bf16.msra.mxu0 %v4346_v10  ;;  %3359 = vmatprep.mubr.msk.f32.mxu0 %vm4230_vm0, %v4632_v1 }
 0xc8b   :  { %3792 = vmatprep.subr.bf16.mxu0 %v4229_v0 }
 0xc8e   :  { %3794 = vmatpush3.bf16.msra.mxu0 %v4349_v15 }
 0xc8f   :  { %3795 = vmatprep.subr.bf16.mxu0 %v4229_v0 }
 0xc92   :  { %3797 = vmatpush3.bf16.msra.mxu0 %v4353_v21 }
 0xc93   :  { %3798 = vmatprep.subr.bf16.mxu0 %v4229_v0 }
 0xc96   :  { %3800 = vmatpush3.bf16.msra.mxu0 %v4357_v28 }
 0xc97   :  { %3801 = vmatprep.subr.bf16.mxu0 %v4229_v0 }
 0xc9a   :  { %3803 = vmatpush3.bf16.msra.mxu0 %v4361_v34 }
 0xc9b   :  { %3804 = vmatprep.subr.bf16.mxu0 %v4229_v0 }
 0xc9e   :  { %3806 = vmatpush3.bf16.msra.mxu0 %v4365_v40 }
 0xc9f   :  { %3807 = vmatprep.subr.bf16.mxu0 %v4229_v0 }
 0xca2   :  { %3809 = vmatpush3.bf16.msra.mxu0 %v4369_v46 }
 0xca3   :  { %3810 = vmatprep.subr.bf16.mxu0 %v4229_v0 }
 0xca6   :  { %3812 = vmatpush3.bf16.msra.mxu0 %v4373_v50 }
 0xd5c   :  { %v1983_v10 = vpop.f32.mrb[28].mxu0 }
 0xd5d   :  { %v1988_v15 = vrot.slane %v1983_v10, 3  ;;  %v1989_v21 = vrot.slane %v1983_v10, 4  ;;  %v1990_v28 = vrot.slane %v1983_v10, 5  ;;  %v1991_v1 = vrot.slane %v1983_v10, 6  ;;  %v3291_v52 = vpop.f32.mrb[29].mxu0 }
 0xd5e   :  { %v1992_v54 = vrot.slane %v1983_v10, 7  ;;  %v1993_v34 = vrot.slane %v1983_v10, 1  ;;  %v1994_v58 = vrot.slane %v1983_v10, 2  ;;  %v2008_v62 = vadd.f32 %v1983_v10, %v4440_v39 }
 0xd5f   :  { %v2003_v55 = vadd.f32 %v1988_v15, %v4419_v7  ;;  %v2004_v40 = vadd.f32 %v1989_v21, %v4421_v12  ;;  %v2005_v56 = vadd.f32 %v1990_v28, %v4423_v16  ;;  %v2006_v46 = vadd.f32 %v1991_v1, %v4425_v19 }
 0xd60   :  { %v2007_v50 = vadd.f32 %v1992_v54, %v4431_v27  ;;  %v2009_v60 = vadd.f32 %v1993_v34, %v4449_v51  ;;  %v2010_v61 = vadd.f32 %v1994_v58, %v4454_v57 }
 0xd61   :  { %4055 = vtanh.f32 %v2003_v55 }
 0xd62   :  { %4057 = vtanh.f32 %v2004_v40 }
 0xd63   :  { %4059 = vtanh.f32 %v2005_v56 }
 0xd64   :  { %4061 = vtanh.f32 %v2006_v46 }
 0xd65   :  { %4063 = vtanh.f32 %v2007_v50 }
 0xd66   :  { %4065 = vtanh.f32 %v2009_v60 }
 0xd67   :  { %4067 = vtanh.f32 %v2010_v61 }
 0xd68   :  { %4069 = vtanh.f32 %v2008_v62 }
 0xd6b   :  { %v4056_v63 = vpop.eup %4055 }
 0xd6c   :  { %v4058_v2 = vpop.eup %4057  ;;  %v2027_v3 = vrot.slane %v4056_v63, 5 }
 0xd6d   :  { %v4060_v5 = vpop.eup %4059  ;;  %v2028_v38 = vrot.slane %v4058_v2, 4 }
 0xd6e   :  { %v4062_v23 = vpop.eup %4061  ;;  %v2030_v26 = vrot.slane %v4060_v5, 3 }
 0xd6f   :  { %v4064_v8 = vpop.eup %4063  ;;  %v2029_v31 = vsel %vm396_vm1, %v2028_v38, %v2027_v3  ;;  %v2032_v9 = vrot.slane %v4062_v23, 2 }
 0xd70   :  { %v4066_v11 = vpop.eup %4065  ;;  %v2031_v33 = vsel %vm399_vm2, %v2030_v26, %v2029_v31  ;;  %v2034_v13 = vrot.slane %v4064_v8, 1 }
 0xd71   :  { %v4068_v43 = vpop.eup %4067  ;;  %v2033_v14 = vsel %vm402_vm3, %v2032_v9, %v2031_v33  ;;  %v2037_v6 = vrot.slane %v4066_v11, 7 }
 0xd72   :  { %v4070_v53 = vpop.eup %4069  ;;  %v2035_v4 = vsel %vm405_vm4, %v2034_v13, %v2033_v14  ;;  %v2039_v59 = vrot.slane %v4068_v43, 6  ;;  %v2301_v43 = vld [vmem:[#allocation9 + $0x20] sm:$0xff]  ;;  %v2302_v14 = vld [vmem:[#allocation9 + $0x28] sm:$0xff] }
 0xd73   :  { %v2036_v17 = vsel %vm408_vm5, %v4070_v53, %v2035_v4  ;;  %v3820_v53 = vpack.c.bf16 %v2302_v14, %v2301_v43  ;;  %v2303_v4 = vld [vmem:[#allocation9 + $0x30] sm:$0xff] }
 0xd74   :  { %v2038_v18 = vsel %vm411_vm6, %v2037_v6, %v2036_v17  ;;  %v2304_v6 = vld [vmem:[#allocation9 + $0x38] sm:$0xff] }
 0xd75   :  { %v2040_v20 = vsel %vm414_vm7, %v2039_v59, %v2038_v18  ;;  %v3823_v17 = vpack.c.bf16 %v2304_v6, %v2303_v4  ;;  %v2305_v59 = vld [vmem:[#allocation9 + $0x40] sm:$0xff]  ;;  %v2306_v18 = vld [vmem:[#allocation9 + $0x48] sm:$0xff] }
 0xd76   :  { %3325 = vmatmul.mubr.f32.vlgmr.msra.gmra.mrb[14].mxu1 %v2040_v20  ;;  %v3826_v20 = vpack.c.bf16 %v2306_v18, %v2305_v59  ;;  %v2424_v59 = vld [vmem:[%s4960_s5] ss:$0 sm:$0xff] }
 0xd77   :  { %3394 = vmatprep.mubr.msk.f32.mxu1 %vm4230_vm0, %v4104_v22  ;;  %3815 = vmatpush3.bf16.msra.mxu1 %v3814_v30  ;;  %v2307_v22 = vld [vmem:[#allocation9 + $0x50] sm:$0xff]  ;;  %v2310_v30 = vld [vmem:[#allocation9 + $0x68] sm:$0xff] }
 0xd78   :  { %3816 = vmatprep.subr.bf16.mxu1 %v4229_v0  ;;  %v3829_v25 = vpack.c.bf16 %v2308_v24, %v2307_v22  ;;  %v3832_v32 = vpack.c.bf16 %v2310_v30, %v2309_v29 }
 0xd7b   :  { %3818 = vmatpush3.bf16.msra.mxu1 %v3817_v35  ;;  %v2311_v35 = vld [vmem:[#allocation9 + $0x70] sm:$0xff] }
 0xd7c   :  { %3819 = vmatprep.subr.bf16.mxu1 %v4229_v0 }
 0xd7f   :  { %3821 = vmatpush3.bf16.msra.mxu1 %v3820_v53 }
 0xd80   :  { %3822 = vmatprep.subr.bf16.mxu1 %v4229_v0 }
 0xd83   :  { %3824 = vmatpush3.bf16.msra.mxu1 %v3823_v17 }
 0xd84   :  { %3825 = vmatprep.subr.bf16.mxu1 %v4229_v0 }
 0xd87   :  { %3827 = vmatpush3.bf16.msra.mxu1 %v3826_v20 }
 0xd88   :  { %3828 = vmatprep.subr.bf16.mxu1 %v4229_v0 }
 0xd8b   :  { %3830 = vmatpush3.bf16.msra.mxu1 %v3829_v25 }
 0xd8c   :  { %3831 = vmatprep.subr.bf16.mxu1 %v4229_v0 }
 0xd8f   :  { %3833 = vmatpush3.bf16.msra.mxu1 %v3832_v32 }
 0xd90   :  { %3834 = vmatprep.subr.bf16.mxu1 %v4229_v0 }
 0xe49   :  { %v2108_v36 = vpop.f32.mrb[14].mxu1 }
 0xe4a   :  { %v2113_v37 = vrot.slane %v2108_v36, 2  ;;  %v2114_v41 = vrot.slane %v2108_v36, 3  ;;  %v2115_v42 = vrot.slane %v2108_v36, 4  ;;  %v2116_v44 = vrot.slane %v2108_v36, 5  ;;  %v3326_v45 = vpop.f32.mrb[15].mxu1 }
 0xe4b   :  { %v2117_v47 = vrot.slane %v2108_v36, 6  ;;  %v2118_v48 = vrot.slane %v2108_v36, 7  ;;  %v2119_v21 = vrot.slane %v2108_v36, 1  ;;  %v2134_v34 = vadd.f32 %v2108_v36, %v4449_v51  ;;  %v2312_v36 = vld [vmem:[#allocation9 + $0x78] sm:$0xff] }
 0xe4c   :  { %v2128_v49 = vadd.f32 %v2113_v37, %v4419_v7  ;;  %v2129_v10 = vadd.f32 %v2114_v41, %v4421_v12  ;;  %v2130_v15 = vadd.f32 %v2115_v42, %v4423_v16  ;;  %v2131_v28 = vadd.f32 %v2116_v44, %v4425_v19 }
 0xe4d   :  { %v2132_v1 = vadd.f32 %v2117_v47, %v4431_v27  ;;  %v2133_v52 = vadd.f32 %v2118_v48, %v4440_v39  ;;  %v2135_v54 = vadd.f32 %v2119_v21, %v4454_v57  ;;  %v3835_v37 = vpack.c.bf16 %v2312_v36, %v2311_v35 }
 0xe4e   :  { %4071 = vtanh.f32 %v2128_v49 }
 0xe4f   :  { %4073 = vtanh.f32 %v2129_v10  ;;  %3836 = vmatpush3.bf16.msra.mxu1 %v3835_v37 }
 0xe50   :  { %4075 = vtanh.f32 %v2130_v15 }
 0xe51   :  { %4077 = vtanh.f32 %v2131_v28 }
 0xe52   :  { %4079 = vtanh.f32 %v2132_v1 }
 0xe53   :  { %4081 = vtanh.f32 %v2133_v52 }
 0xe54   :  { %4083 = vtanh.f32 %v2135_v54 }
 0xe55   :  { %4085 = vtanh.f32 %v2134_v34 }
 0xe58   :  { %v4072_v55 = vpop.eup %4071 }
 0xe59   :  { %v4074_v40 = vpop.eup %4073  ;;  %v2152_v56 = vrot.slane %v4072_v55, 6 }
 0xe5a   :  { %v4076_v58 = vpop.eup %4075  ;;  %v2153_v46 = vrot.slane %v4074_v40, 5 }
 0xe5b   :  { %v4078_v50 = vpop.eup %4077  ;;  %v2155_v60 = vrot.slane %v4076_v58, 4 }
 0xe5c   :  { %v4080_v61 = vpop.eup %4079  ;;  %v2154_v62 = vsel %vm396_vm1, %v2153_v46, %v2152_v56  ;;  %v2157_v63 = vrot.slane %v4078_v50, 3 }
 0xe5d   :  { %v4082_v2 = vpop.eup %4081  ;;  %v2156_v3 = vsel %vm399_vm2, %v2155_v60, %v2154_v62  ;;  %v2159_v5 = vrot.slane %v4080_v61, 2 }
 0xe5e   :  { %v4084_v38 = vpop.eup %4083  ;;  %v2158_v23 = vsel %vm402_vm3, %v2157_v63, %v2156_v3  ;;  %v2161_v26 = vrot.slane %v4082_v2, 1 }
 0xe5f   :  { %v2160_v8 = vsel %vm405_vm4, %v2159_v5, %v2158_v23  ;;  %v4086_v31 = vpop.eup %4085  ;;  %v2164_v11 = vrot.slane %v4084_v38, 7 }
 0xe60   :  { %v2162_v9 = vsel %vm408_vm5, %v2161_v26, %v2160_v8 }
 0xe61   :  { %v2163_v33 = vsel %vm411_vm6, %v4086_v31, %v2162_v9 }
 0xe62   :  { %v2165_v13 = vsel %vm414_vm7, %v2164_v11, %v2163_v33 }
 0xe63   :  { %3360 = vmatmul.mubr.f32.vlgmr.msra.gmra.mrb[30].mxu0 %v2165_v13 }
 0xf36   :  { %v2233_v41 = vpop.f32.mrb[30].mxu0 }
 0xf37   :  { %v2238_v42 = vrot.slane %v2233_v41, 1  ;;  %v2239_v44 = vrot.slane %v2233_v41, 2  ;;  %v2240_v45 = vrot.slane %v2233_v41, 3  ;;  %v2241_v47 = vrot.slane %v2233_v41, 4  ;;  %v3361_v48 = vpop.f32.mrb[31].mxu0 }
 0xf38   :  { %v2242_v49 = vrot.slane %v2233_v41, 5  ;;  %v2243_v10 = vrot.slane %v2233_v41, 6  ;;  %v2260_v15 = vadd.f32 %v2233_v41, %v4454_v57  ;;  %v2244_v21 = vrot.slane %v2233_v41, 7 }
 0xf39   :  { %v2253_v28 = vadd.f32 %v2238_v42, %v4419_v7  ;;  %v2254_v1 = vadd.f32 %v2239_v44, %v4421_v12  ;;  %v2255_v52 = vadd.f32 %v2240_v45, %v4423_v16  ;;  %v2256_v0 = vadd.f32 %v2241_v47, %v4425_v19 }
 0xf3a   :  { %4087 = vtanh.f32 %v2260_v15  ;;  %v2257_v54 = vadd.f32 %v2242_v49, %v4431_v27  ;;  %v2258_v34 = vadd.f32 %v2243_v10, %v4440_v39  ;;  %v2259_v55 = vadd.f32 %v2244_v21, %v4449_v51 }
 0xf3b   :  { %4089 = vtanh.f32 %v2253_v28 }
 0xf3c   :  { %4091 = vtanh.f32 %v2254_v1 }
 0xf3d   :  { %4093 = vtanh.f32 %v2255_v52 }
 0xf3e   :  { %4095 = vtanh.f32 %v2256_v0 }
 0xf3f   :  { %4097 = vtanh.f32 %v2257_v54 }
 0xf40   :  { %4099 = vtanh.f32 %v2258_v34 }
 0xf41   :  { %4101 = vtanh.f32 %v2259_v55 }
 0xf44   :  { %v4088_v7 = vpop.eup %4087 }
 0xf45   :  { %v4090_v12 = vpop.eup %4089  ;;  %v2288_v43 = vrot.slane %v4088_v7, 1 }
 0xf46   :  { %v4092_v57 = vpop.eup %4091  ;;  %2292 = vst [vmem:[#allocation2 - $0x7] sm:$0x80] %v4090_v12  ;;  %v2320_v16 = vrot.slane %v4090_v12, 7 }
 0xf47   :  { %v4094_v19 = vpop.eup %4093  ;;  %v2277_v40 = vrot.slane %v4092_v57, 7  ;;  %v2321_v56 = vrot.slane %v4092_v57, 6 }
 0xf48   :  { %v4096_v27 = vpop.eup %4095  ;;  %v2278_v58 = vrot.slane %v4094_v19, 6  ;;  %v2323_v46 = vrot.slane %v4094_v19, 5 }
 0xf49   :  { %v4098_v39 = vpop.eup %4097  ;;  %v2280_v50 = vrot.slane %v4096_v27, 5  ;;  %v2322_v60 = vsel %vm396_vm1, %v2321_v56, %v2320_v16  ;;  %v2325_v51 = vrot.slane %v4096_v27, 4 }
 0xf4a   :  { %v4100_v61 = vpop.eup %4099  ;;  %v2279_v62 = vsel %vm396_vm1, %v2278_v58, %v2277_v40  ;;  %v2282_v63 = vrot.slane %v4098_v39, 4  ;;  %v2324_v2 = vsel %vm399_vm2, %v2323_v46, %v2322_v60  ;;  %v2327_v3 = vrot.slane %v4098_v39, 3 }
 0xf4b   :  { %v4102_v5 = vpop.eup %4101  ;;  %v2281_v38 = vsel %vm399_vm2, %v2280_v50, %v2279_v62  ;;  %v2284_v23 = vrot.slane %v4100_v61, 3  ;;  %v2326_v26 = vsel %vm402_vm3, %v2325_v51, %v2324_v2  ;;  %v2329_v8 = vrot.slane %v4100_v61, 2 }
 0xf4c   :  { %v2283_v31 = vsel %vm402_vm3, %v2282_v63, %v2281_v38  ;;  %v2286_v9 = vrot.slane %v4102_v5, 2  ;;  %v2328_v11 = vsel %vm405_vm4, %v2327_v3, %v2326_v26  ;;  %v2331_v33 = vrot.slane %v4102_v5, 1 }
 0xf4d   :  { %v2285_v13 = vsel %vm405_vm4, %v2284_v23, %v2283_v31  ;;  %v2330_v14 = vsel %vm408_vm5, %v2329_v8, %v2328_v11 }
 0xf4e   :  { %v2287_v53 = vsel %vm408_vm5, %v2286_v9, %v2285_v13  ;;  %v2332_v4 = vsel %vm411_vm6, %v2331_v33, %v2330_v14 }
 0xf4f   :  { %v2289_v6 = vsel %vm411_vm6, %v2288_v43, %v2287_v53  ;;  %v2333_v17 = vsel %vm414_vm7, %v4088_v7, %v2332_v4 }
 0xf50   :  { %2293 = vst [vmem:[#allocation2 + $0x1] sm:$0x7f] %v2289_v6  ;;  %3395 = vmatmul.mubr.f32.vlgmr.msra.gmra.mrb[16].mxu1 %v2333_v17 }
0x1023   :  { %v2401_v18 = vpop.f32.mrb[16].mxu1 }
0x1024   :  { %v2402_v20 = vadd.f32 %v2424_v59, %v2401_v18  ;;  %v3396_v22 = vpop.f32.mrb[17].mxu1 }
0x1026   :  { %2405 = vst [vmem:[#allocation11] sm:$0xff] %v2402_v20 }
0x1027   :  { %4204 = shalt.err (!%p4201_p8)
}
0x1028   :  { %s4205_s27 = scalar_lea.hbm %s4961_s6, 128 }
0x1029   :  { %p4206_p9 = scmp.ne.s32.totalorder %s4961_s6, %s4205_s27  ;;  %p4209_p10 = scmp.lt.u32.totalorder %s4205_s27, %s4961_s6 }
0x102b   :  { %p4211_p11 = pnand %p4209_p10, %p4206_p9 }
0x102d   :  { %4214 = shalt.err (!%p4211_p11)
}
0x102e   :  { %2415 = dma.vmem_to_hbm [thread:$0]  %s2413_s22, 128, %s4961_s6, [#allocation5]  }
0x102f   :  { %4221 = dma.done.wait [#allocation5], 128  }
0x1030   :  { %4222 = vsyncadd [#allocation5], 4294967168 }
0x1031   :  { %2419 = vsyncpa [#allocation4], 1 }
0x1032   :  { %2420 = vsyncpa [#allocation7], 1 }
0x1033   :  { %2421 = vsyncpa [#allocation10], 1 }
0x1034   :  { %2422 = vsyncpa [#allocation5], 1 }

</bundles_post_ra>
